<compile_context>
chip_gen: v6e
topology: v6e:2x2x1
jax: 0.10.0
libtpu: 0.0.40
codegen_flags: <defaults>
</compile_context>

<pallas_src>
import math
from functools import partial

import jax
import jax.numpy as jnp
from jax import lax
from jax.experimental import pallas as pl
from jax.experimental.pallas import tpu as pltpu

# ---- small (but lane-dense) synthetic BERT config ----
VOCAB = 100
HIDDEN = 128                 # multiple of 128 -> lane-dense activations/weights
N_LAYERS = 2
N_HEADS = 4
HEAD_DIM = HIDDEN // N_HEADS
INTERMEDIATE = 512           # multiple of 128
MAX_POS = 64
TYPE_VOCAB = 2
LN_EPS = 1e-12
NUM_LAYERS_OF_EMBEDDED = 2

NEG_MASK = -1e9              # finite additive mask value (HF uses finfo.min)


# ----------------------------- in-kernel helpers ----------------------------

def _layernorm(h, g, b):
    mu = jnp.mean(h, axis=-1, keepdims=True)
    var = jnp.mean((h - mu) ** 2, axis=-1, keepdims=True)
    return (h - mu) * lax.rsqrt(var + LN_EPS) * g + b


def _gelu_exact(y):
    # exact (erf-based) GELU, matching HF BERT's default hidden_act="gelu"
    return 0.5 * y * (1.0 + lax.erf(y * (1.0 / math.sqrt(2.0))))


# ------------------------------ fused kernel --------------------------------

def _bert_fused_kernel(emb_ref, add_mask_ref, mask_col_ref,
                       emb_g_ref, emb_b_ref,
                       wqkv_ref, bqkv_ref, wo_ref, bo_ref,
                       ln1_g_ref, ln1_b_ref,
                       wi_ref, bi_ref, wf_ref, bf_ref,
                       ln2_g_ref, ln2_b_ref,
                       hidden_ref, embedded_ref,
                       h_sc, agg_sc,
                       *, n_heads, head_dim, n_layers, k_last, scale):
    l = pl.program_id(1)

    # ---- l == 0: embedding LayerNorm -> resident hidden state; zero agg ----
    @pl.when(l == 0)
    def _():
        h_sc[...] = _layernorm(emb_ref[...], emb_g_ref[...], emb_b_ref[...])
        agg_sc[...] = jnp.zeros_like(agg_sc)

    x = h_sc[...]                                   # [S, H] f32 (VMEM-resident)
    S, H = x.shape
    mask = add_mask_ref[...]                        # [1, S] additive HF mask
    x_bf = x.astype(jnp.bfloat16)

    # ---- fused QKV projection (bf16 MXU inputs, f32 accumulation) ----
    qkv = jnp.dot(x_bf, wqkv_ref[...],
                  preferred_element_type=jnp.float32) + bqkv_ref[...]   # [S, 3H]

    # ---- multi-head attention, all heads of this batch element ----
    # No kh.T transpose (dot_general contracts last dims) and no ctx concat:
    # each head's context is folded directly into the output projection by
    # accumulating against the head's rows of Wo (lane-dense accumulator).
    attn = bo_ref[...]                              # [1, H] f32, broadcasts
    for hd in range(n_heads):
        lo = hd * head_dim
        qh = qkv[:, lo:lo + head_dim].astype(jnp.bfloat16)              # [S, D]
        kh = qkv[:, H + lo:H + lo + head_dim].astype(jnp.bfloat16)      # [S, D]
        vh = qkv[:, 2 * H + lo:2 * H + lo + head_dim].astype(jnp.bfloat16)
        s = lax.dot_general(qh, kh, (((1,), (1,)), ((), ())),
                            preferred_element_type=jnp.float32)          # [S, S]
        s = s * scale + mask
        s = s - jnp.max(s, axis=-1, keepdims=True)
        p = jnp.exp(s)
        p = p * pl.reciprocal(jnp.sum(p, axis=-1, keepdims=True), approx=True)
        ctx_h = jnp.dot(p.astype(jnp.bfloat16), vh,
                        preferred_element_type=jnp.float32)               # [S, D]
        attn = attn + jnp.dot(ctx_h.astype(jnp.bfloat16),
                              wo_ref[lo:lo + head_dim, :],                # bf16 [D, H]
                              preferred_element_type=jnp.float32)         # [S, H]

    # ---- residual + LN1 ----
    h1 = _layernorm(attn + x, ln1_g_ref[...], ln1_b_ref[...])

    # ---- GELU FFN + residual + LN2 ----
    inter = jnp.dot(h1.astype(jnp.bfloat16), wi_ref[...],
                    preferred_element_type=jnp.float32) + bi_ref[...]
    inter = _gelu_exact(inter)
    ffn = jnp.dot(inter.astype(jnp.bfloat16), wf_ref[...],
                  preferred_element_type=jnp.float32) + bf_ref[...]
    out = _layernorm(ffn + h1, ln2_g_ref[...], ln2_b_ref[...])

    # hidden state stays in VMEM for the next layer step
    h_sc[...] = out

    # ---- accumulate last-k hidden states for the "embedded" head ----
    @pl.when(l >= n_layers - k_last)
    def _():
        agg_sc[...] = agg_sc[...] + out

    # ---- l == L-1: write both outputs (blocks are resident across l) ----
    @pl.when(l == n_layers - 1)
    def _():
        hidden_ref[...] = out
        # reference: stack(last k).mean(1) then / k  ->  sum / k^2, then * mask
        embedded_ref[...] = (agg_sc[...] * (1.0 / (k_last * k_last))
                             ) * mask_col_ref[...]


# ------------------------------ parameters ----------------------------------

def init_params(key):
    def normal(k, shape):
        return (0.02 * jax.random.normal(k, shape)).astype(jnp.float32)

    H, I, L = HIDDEN, INTERMEDIATE, N_LAYERS
    keys = jax.random.split(key, 3 + L)
    params = {
        "word_emb": normal(keys[0], (VOCAB, H)),
        "pos_emb": normal(keys[1], (MAX_POS, H)),
        "type_emb": normal(keys[2], (TYPE_VOCAB, H)),
        "emb_ln_g": jnp.ones((1, H), jnp.float32),
        "emb_ln_b": jnp.zeros((1, H), jnp.float32),
    }
    wqkv, wo, wi, wf = [], [], [], []
    for li in range(L):
        lk = jax.random.split(keys[3 + li], 6)
        wq = normal(lk[0], (H, H))
        wk = normal(lk[1], (H, H))
        wv = normal(lk[2], (H, H))
        wqkv.append(jnp.concatenate([wq, wk, wv], axis=1))   # [H, 3H]
        wo.append(normal(lk[3], (H, H)))
        wi.append(normal(lk[4], (H, I)))
        wf.append(normal(lk[5], (I, H)))
    params.update({
        # stacked per-layer weights, bf16 for native MXU throughput & half DMA
        "wqkv": jnp.stack(wqkv).astype(jnp.bfloat16),     # [L, H, 3H]
        "bqkv": jnp.zeros((L, 1, 3 * H), jnp.float32),
        "wo": jnp.stack(wo).astype(jnp.bfloat16),          # [L, H, H]
        "bo": jnp.zeros((L, 1, H), jnp.float32),
        "ln1_g": jnp.ones((L, 1, H), jnp.float32),
        "ln1_b": jnp.zeros((L, 1, H), jnp.float32),
        "wi": jnp.stack(wi).astype(jnp.bfloat16),           # [L, H, I]
        "bi": jnp.zeros((L, 1, I), jnp.float32),
        "wf": jnp.stack(wf).astype(jnp.bfloat16),           # [L, I, H]
        "bf": jnp.zeros((L, 1, H), jnp.float32),
        "ln2_g": jnp.ones((L, 1, H), jnp.float32),
        "ln2_b": jnp.zeros((L, 1, H), jnp.float32),
    })
    return params


# ------------------------------- forward -------------------------------------

def bert_forward(params, input_ids, attention_mask):
    """Equivalent of BertModel.forward (use_sub_sentence_represent=False) on
    pre-tokenized ids.  Returns {'embedded', 'masks', 'hidden'}."""
    # TODO(synk): the HF tokenizer (string captions -> ids) and the special-token
    # sub-sentence mask path have no array-level Pallas equivalent; inputs are ids.
    B, S = input_ids.shape
    H, I, L = HIDDEN, INTERMEDIATE, N_LAYERS
    mask_f = attention_mask.astype(jnp.float32)

    # embeddings (table gathers are JAX glue; LayerNorm is fused into the kernel)
    pos_ids = jnp.arange(S)
    emb = (params["word_emb"][input_ids]
           + params["pos_emb"][pos_ids][None, :, :]
           + params["type_emb"][0][None, None, :])            # token_type_ids = 0

    add_mask = ((1.0 - mask_f) * NEG_MASK)[:, None, :]        # [B, 1, S] additive
    mask_col = mask_f[:, :, None]                             # [B, S, 1] multiplicative

    kernel = partial(_bert_fused_kernel,
                     n_heads=N_HEADS, head_dim=HEAD_DIM, n_layers=L,
                     k_last=NUM_LAYERS_OF_EMBEDDED,
                     scale=1.0 / math.sqrt(HEAD_DIM))

    hidden, embedded = pl.pallas_call(
        kernel,
        out_shape=(jax.ShapeDtypeStruct((B, S, H), jnp.float32),
                   jax.ShapeDtypeStruct((B, S, H), jnp.float32)),
        grid=(B, L),
        in_specs=[
            pl.BlockSpec((None, S, H), lambda b, l: (b, 0, 0)),       # emb sum
            pl.BlockSpec((None, 1, S), lambda b, l: (b, 0, 0)),       # additive mask
            pl.BlockSpec((None, S, 1), lambda b, l: (b, 0, 0)),       # mult. mask col
            pl.BlockSpec((1, H), lambda b, l: (0, 0)),                # emb_ln gamma
            pl.BlockSpec((1, H), lambda b, l: (0, 0)),                # emb_ln beta
            pl.BlockSpec((None, H, 3 * H), lambda b, l: (l, 0, 0)),   # wqkv (bf16)
            pl.BlockSpec((None, 1, 3 * H), lambda b, l: (l, 0, 0)),   # bqkv
            pl.BlockSpec((None, H, H), lambda b, l: (l, 0, 0)),       # wo (bf16)
            pl.BlockSpec((None, 1, H), lambda b, l: (l, 0, 0)),       # bo
            pl.BlockSpec((None, 1, H), lambda b, l: (l, 0, 0)),       # ln1 gamma
            pl.BlockSpec((None, 1, H), lambda b, l: (l, 0, 0)),       # ln1 beta
            pl.BlockSpec((None, H, I), lambda b, l: (l, 0, 0)),       # wi (bf16)
            pl.BlockSpec((None, 1, I), lambda b, l: (l, 0, 0)),       # bi
            pl.BlockSpec((None, I, H), lambda b, l: (l, 0, 0)),       # wf (bf16)
            pl.BlockSpec((None, 1, H), lambda b, l: (l, 0, 0)),       # bf
            pl.BlockSpec((None, 1, H), lambda b, l: (l, 0, 0)),       # ln2 gamma
            pl.BlockSpec((None, 1, H), lambda b, l: (l, 0, 0)),       # ln2 beta
        ],
        out_specs=(pl.BlockSpec((None, S, H), lambda b, l: (b, 0, 0)),  # hidden
                   pl.BlockSpec((None, S, H), lambda b, l: (b, 0, 0))), # embedded
        scratch_shapes=[pltpu.VMEM((S, H), jnp.float32),   # resident hidden state
                        pltpu.VMEM((S, H), jnp.float32)],  # last-k aggregation acc
        compiler_params=pltpu.CompilerParams(
            dimension_semantics=("parallel", "arbitrary")),
    )(emb, add_mask, mask_col,
      params["emb_ln_g"], params["emb_ln_b"],
      params["wqkv"], params["bqkv"], params["wo"], params["bo"],
      params["ln1_g"], params["ln1_b"],
      params["wi"], params["bi"], params["wf"], params["bf"],
      params["ln2_g"], params["ln2_b"])

    return {"embedded": embedded, "masks": attention_mask, "hidden": hidden}


# --------------------------------- main ---------------------------------------

if __name__ == "__main__":
    key = jax.random.PRNGKey(0)
    pkey, ikey = jax.random.split(key)
    params = init_params(pkey)

    B, S = 2, 16
    input_ids = jax.random.randint(ikey, (B, S), 1, VOCAB, dtype=jnp.int32)
    attention_mask = jnp.concatenate(
        [jnp.ones((B, S - 4), jnp.int32),
         jnp.array([[0, 0, 0, 0], [1, 1, 1, 1]], jnp.int32)], axis=1)   # [2, 16]

    out = jax.jit(bert_forward)(params, input_ids, attention_mask)
    jax.block_until_ready(out)
    assert out["embedded"].shape == (B, S, HIDDEN)
    assert out["hidden"].shape == (B, S, HIDDEN)
    assert out["masks"].shape == (B, S)
    assert bool(jnp.all(jnp.isfinite(out["embedded"])))
    assert bool(jnp.all(jnp.isfinite(out["hidden"])))
    print("KERNEL_OK")
</pallas_src>

<mosaic_0001>
module attributes {stable_mosaic.version = 11 : i64} {
  func.func @_bert_fused_kernel(%arg0: i32, %arg1: i32, %arg2: memref<1x16x128xf32, #tpu.memory_space<vmem>>, %arg3: memref<1x1x16xf32, #tpu.memory_space<vmem>>, %arg4: memref<1x16x1xf32, #tpu.memory_space<vmem>>, %arg5: memref<1x128xf32, #tpu.memory_space<vmem>>, %arg6: memref<1x128xf32, #tpu.memory_space<vmem>>, %arg7: memref<1x128x384xbf16, #tpu.memory_space<vmem>>, %arg8: memref<1x1x384xf32, #tpu.memory_space<vmem>>, %arg9: memref<1x128x128xbf16, #tpu.memory_space<vmem>>, %arg10: memref<1x1x128xf32, #tpu.memory_space<vmem>>, %arg11: memref<1x1x128xf32, #tpu.memory_space<vmem>>, %arg12: memref<1x1x128xf32, #tpu.memory_space<vmem>>, %arg13: memref<1x128x512xbf16, #tpu.memory_space<vmem>>, %arg14: memref<1x1x512xf32, #tpu.memory_space<vmem>>, %arg15: memref<1x512x128xbf16, #tpu.memory_space<vmem>>, %arg16: memref<1x1x128xf32, #tpu.memory_space<vmem>>, %arg17: memref<1x1x128xf32, #tpu.memory_space<vmem>>, %arg18: memref<1x1x128xf32, #tpu.memory_space<vmem>>, %arg19: memref<1x16x128xf32, #tpu.memory_space<vmem>>, %arg20: memref<1x16x128xf32, #tpu.memory_space<vmem>>, %arg21: memref<16x128xf32, #tpu.memory_space<vmem>>, %arg22: memref<16x128xf32, #tpu.memory_space<vmem>>) attributes {dimension_semantics = [#tpu.dimension_semantics<parallel>, #tpu.dimension_semantics<arbitrary>], iteration_bounds = array<i64: 2, 2>, scalar_prefetch = 0 : i64, scratch_operands = 2 : i64, tpu.core_type = #tpu.core_type<tc>, window_params = [{transform_indices = @transform_0, window_bounds = array<i64: 1, 16, 128>}, {transform_indices = @transform_1, window_bounds = array<i64: 1, 1, 16>}, {transform_indices = @transform_2, window_bounds = array<i64: 1, 16, 1>}, {pipeline_mode = #tpu.pipeline_mode<synchronous>, transform_indices = @transform_3, window_bounds = array<i64: 1, 128>}, {pipeline_mode = #tpu.pipeline_mode<synchronous>, transform_indices = @transform_4, window_bounds = array<i64: 1, 128>}, {transform_indices = @transform_5, window_bounds = array<i64: 1, 128, 384>}, {transform_indices = @transform_6, window_bounds = array<i64: 1, 1, 384>}, {transform_indices = @transform_7, window_bounds = array<i64: 1, 128, 128>}, {transform_indices = @transform_8, window_bounds = array<i64: 1, 1, 128>}, {transform_indices = @transform_9, window_bounds = array<i64: 1, 1, 128>}, {transform_indices = @transform_10, window_bounds = array<i64: 1, 1, 128>}, {transform_indices = @transform_11, window_bounds = array<i64: 1, 128, 512>}, {transform_indices = @transform_12, window_bounds = array<i64: 1, 1, 512>}, {transform_indices = @transform_13, window_bounds = array<i64: 1, 512, 128>}, {transform_indices = @transform_14, window_bounds = array<i64: 1, 1, 128>}, {transform_indices = @transform_15, window_bounds = array<i64: 1, 1, 128>}, {transform_indices = @transform_16, window_bounds = array<i64: 1, 1, 128>}, {transform_indices = @transform_17, window_bounds = array<i64: 1, 16, 128>}, {transform_indices = @transform_18, window_bounds = array<i64: 1, 16, 128>}]} {
    %c0_i32 = arith.constant 0 : i32
    %0 = arith.cmpi eq, %arg1, %c0_i32 : i32
    %1 = arith.extui %0 : i1 to i32
    %c0_i32_0 = arith.constant 0 : i32
    %2 = arith.cmpi ne, %1, %c0_i32_0 : i32
    scf.if %2 {
      %c0_91 = arith.constant 0 : index
      %c0_92 = arith.constant 0 : index
      %c0_93 = arith.constant 0 : index
      %214 = vector.load %arg2[%c0_91, %c0_92, %c0_93] : memref<1x16x128xf32, #tpu.memory_space<vmem>>, vector<1x16x128xf32>
      %215 = vector.shape_cast %214 : vector<1x16x128xf32> to vector<16x128xf32>
      %c0_94 = arith.constant 0 : index
      %c0_95 = arith.constant 0 : index
      %216 = vector.load %arg5[%c0_94, %c0_95] : memref<1x128xf32, #tpu.memory_space<vmem>>, vector<1x128xf32>
      %c0_96 = arith.constant 0 : index
      %c0_97 = arith.constant 0 : index
      %217 = vector.load %arg6[%c0_96, %c0_97] : memref<1x128xf32, #tpu.memory_space<vmem>>, vector<1x128xf32>
      %cst_98 = arith.constant dense<0.000000e+00> : vector<16xf32>
      %218 = vector.multi_reduction <add>, %215, %cst_98 [1] : vector<16x128xf32> to vector<16xf32>
      %219 = vector.shape_cast %218 : vector<16xf32> to vector<16x1xf32>
      %cst_99 = arith.constant 1.280000e+02 : f32
      %220 = vector.broadcast %cst_99 : f32 to vector<16x1xf32>
      %221 = arith.divf %219, %220 : vector<16x1xf32>
      %222 = vector.broadcast %221 : vector<16x1xf32> to vector<16x128xf32>
      %223 = arith.subf %215, %222 : vector<16x128xf32>
      %224 = arith.mulf %223, %223 : vector<16x128xf32>
      %cst_100 = arith.constant dense<0.000000e+00> : vector<16xf32>
      %225 = vector.multi_reduction <add>, %224, %cst_100 [1] : vector<16x128xf32> to vector<16xf32>
      %226 = vector.shape_cast %225 : vector<16xf32> to vector<16x1xf32>
      %cst_101 = arith.constant 1.280000e+02 : f32
      %227 = vector.broadcast %cst_101 : f32 to vector<16x1xf32>
      %228 = arith.divf %226, %227 : vector<16x1xf32>
      %229 = vector.broadcast %221 : vector<16x1xf32> to vector<16x128xf32>
      %230 = arith.subf %215, %229 : vector<16x128xf32>
      %cst_102 = arith.constant 9.99999996E-13 : f32
      %231 = vector.broadcast %cst_102 : f32 to vector<16x1xf32>
      %232 = arith.addf %228, %231 : vector<16x1xf32>
      %233 = math.rsqrt %232 : vector<16x1xf32>
      %234 = vector.broadcast %233 : vector<16x1xf32> to vector<16x128xf32>
      %235 = arith.mulf %230, %234 : vector<16x128xf32>
      %236 = vector.broadcast %216 : vector<1x128xf32> to vector<16x128xf32>
      %237 = arith.mulf %235, %236 : vector<16x128xf32>
      %238 = vector.broadcast %217 : vector<1x128xf32> to vector<16x128xf32>
      %239 = arith.addf %237, %238 : vector<16x128xf32>
      %c0_103 = arith.constant 0 : index
      %c0_104 = arith.constant 0 : index
      %240 = vector.load %arg21[%c0_103, %c0_104] : memref<16x128xf32, #tpu.memory_space<vmem>>, vector<16x128xf32>
      tpu.vector_store %arg21[%c0_103, %c0_104], %239 {strides = array<i32>} : memref<16x128xf32, #tpu.memory_space<vmem>>, vector<16x128xf32>,
      %cst_105 = arith.constant 0.000000e+00 : f32
      %241 = vector.broadcast %cst_105 : f32 to vector<16x128xf32>
      %c0_106 = arith.constant 0 : index
      %c0_107 = arith.constant 0 : index
      %242 = vector.load %arg22[%c0_106, %c0_107] : memref<16x128xf32, #tpu.memory_space<vmem>>, vector<16x128xf32>
      tpu.vector_store %arg22[%c0_106, %c0_107], %241 {strides = array<i32>} : memref<16x128xf32, #tpu.memory_space<vmem>>, vector<16x128xf32>,
    } else {
    }
    %c0 = arith.constant 0 : index
    %c0_1 = arith.constant 0 : index
    %3 = vector.load %arg21[%c0, %c0_1] : memref<16x128xf32, #tpu.memory_space<vmem>>, vector<16x128xf32>
    %c0_2 = arith.constant 0 : index
    %c0_3 = arith.constant 0 : index
    %c0_4 = arith.constant 0 : index
    %4 = vector.load %arg3[%c0_2, %c0_3, %c0_4] : memref<1x1x16xf32, #tpu.memory_space<vmem>>, vector<1x1x16xf32>
    %5 = vector.shape_cast %4 : vector<1x1x16xf32> to vector<1x16xf32>
    %6 = arith.truncf %3 : vector<16x128xf32> to vector<16x128xbf16>
    %c0_5 = arith.constant 0 : index
    %c0_6 = arith.constant 0 : index
    %c0_7 = arith.constant 0 : index
    %7 = vector.load %arg7[%c0_5, %c0_6, %c0_7] : memref<1x128x384xbf16, #tpu.memory_space<vmem>>, vector<1x128x384xbf16>
    %8 = vector.shape_cast %7 : vector<1x128x384xbf16> to vector<128x384xbf16>
    %cst = arith.constant dense<0.000000e+00> : vector<16x384xf32>
    %9 = tpu.matmul %6, %8, %cst {dimension_numbers = #tpu.dot_dimension_numbers<[1], [0], [0], [1], [0, 0, 1, 1], [], []>} : vector<16x128xbf16>, vector<128x384xbf16>, vector<16x384xf32> -> vector<16x384xf32>
    %c0_8 = arith.constant 0 : index
    %c0_9 = arith.constant 0 : index
    %c0_10 = arith.constant 0 : index
    %10 = vector.load %arg8[%c0_8, %c0_9, %c0_10] : memref<1x1x384xf32, #tpu.memory_space<vmem>>, vector<1x1x384xf32>
    %11 = vector.shape_cast %10 : vector<1x1x384xf32> to vector<1x384xf32>
    %12 = vector.broadcast %11 : vector<1x384xf32> to vector<16x384xf32>
    %13 = arith.addf %9, %12 : vector<16x384xf32>
    %c0_11 = arith.constant 0 : index
    %c0_12 = arith.constant 0 : index
    %c0_13 = arith.constant 0 : index
    %14 = vector.load %arg10[%c0_11, %c0_12, %c0_13] : memref<1x1x128xf32, #tpu.memory_space<vmem>>, vector<1x1x128xf32>
    %15 = vector.shape_cast %14 : vector<1x1x128xf32> to vector<1x128xf32>
    %16 = vector.extract_strided_slice %13 {offsets = [0, 0], sizes = [16, 32], strides = [1, 1]} : vector<16x384xf32> to vector<16x32xf32>
    %17 = arith.truncf %16 : vector<16x32xf32> to vector<16x32xbf16>
    %18 = vector.extract_strided_slice %13 {offsets = [0, 128], sizes = [16, 32], strides = [1, 1]} : vector<16x384xf32> to vector<16x32xf32>
    %19 = arith.truncf %18 : vector<16x32xf32> to vector<16x32xbf16>
    %20 = vector.extract_strided_slice %13 {offsets = [0, 256], sizes = [16, 32], strides = [1, 1]} : vector<16x384xf32> to vector<16x32xf32>
    %21 = arith.truncf %20 : vector<16x32xf32> to vector<16x32xbf16>
    %cst_14 = arith.constant dense<0.000000e+00> : vector<16x16xf32>
    %22 = tpu.matmul %17, %19, %cst_14 {dimension_numbers = #tpu.dot_dimension_numbers<[1], [1], [0], [0], [0, 0, 1, 0], [], []>} : vector<16x32xbf16>, vector<16x32xbf16>, vector<16x16xf32> -> vector<16x16xf32>
    %cst_15 = arith.constant 0.176776692 : f32
    %23 = vector.broadcast %cst_15 : f32 to vector<16x16xf32>
    %24 = arith.mulf %22, %23 : vector<16x16xf32>
    %25 = vector.broadcast %5 : vector<1x16xf32> to vector<16x16xf32>
    %26 = arith.addf %24, %25 : vector<16x16xf32>
    %cst_16 = arith.constant dense<0xFF800000> : vector<16xf32>
    %27 = vector.multi_reduction <maximumf>, %26, %cst_16 [1] : vector<16x16xf32> to vector<16xf32>
    %28 = vector.shape_cast %27 : vector<16xf32> to vector<16x1xf32>
    %29 = vector.broadcast %28 : vector<16x1xf32> to vector<16x16xf32>
    %30 = arith.subf %26, %29 : vector<16x16xf32>
    %31 = math.exp %30 : vector<16x16xf32>
    %cst_17 = arith.constant dense<0.000000e+00> : vector<16xf32>
    %32 = vector.multi_reduction <add>, %31, %cst_17 [1] : vector<16x16xf32> to vector<16xf32>
    %33 = vector.shape_cast %32 : vector<16xf32> to vector<16x1xf32>
    %34 = tpu.reciprocal %33 {approx = true} : vector<16x1xf32> -> vector<16x1xf32>
    %35 = vector.broadcast %34 : vector<16x1xf32> to vector<16x16xf32>
    %36 = arith.mulf %31, %35 : vector<16x16xf32>
    %37 = arith.truncf %36 : vector<16x16xf32> to vector<16x16xbf16>
    %cst_18 = arith.constant dense<0.000000e+00> : vector<16x32xf32>
    %38 = tpu.matmul %37, %21, %cst_18 {dimension_numbers = #tpu.dot_dimension_numbers<[1], [0], [0], [1], [0, 0, 1, 1], [], []>} : vector<16x16xbf16>, vector<16x32xbf16>, vector<16x32xf32> -> vector<16x32xf32>
    %39 = arith.truncf %38 : vector<16x32xf32> to vector<16x32xbf16>
    %c0_19 = arith.constant 0 : index
    %c0_20 = arith.constant 0 : index
    %c0_21 = arith.constant 0 : index
    %40 = vector.load %arg9[%c0_19, %c0_20, %c0_21] : memref<1x128x128xbf16, #tpu.memory_space<vmem>>, vector<1x32x128xbf16>
    %41 = vector.shape_cast %40 : vector<1x32x128xbf16> to vector<32x128xbf16>
    %cst_22 = arith.constant dense<0.000000e+00> : vector<16x128xf32>
    %42 = tpu.matmul %39, %41, %cst_22 {dimension_numbers = #tpu.dot_dimension_numbers<[1], [0], [0], [1], [0, 0, 1, 1], [], []>} : vector<16x32xbf16>, vector<32x128xbf16>, vector<16x128xf32> -> vector<16x128xf32>
    %43 = vector.broadcast %15 : vector<1x128xf32> to vector<16x128xf32>
    %44 = arith.addf %43, %42 : vector<16x128xf32>
    %45 = vector.extract_strided_slice %13 {offsets = [0, 32], sizes = [16, 32], strides = [1, 1]} : vector<16x384xf32> to vector<16x32xf32>
    %46 = arith.truncf %45 : vector<16x32xf32> to vector<16x32xbf16>
    %47 = vector.extract_strided_slice %13 {offsets = [0, 160], sizes = [16, 32], strides = [1, 1]} : vector<16x384xf32> to vector<16x32xf32>
    %48 = arith.truncf %47 : vector<16x32xf32> to vector<16x32xbf16>
    %49 = vector.extract_strided_slice %13 {offsets = [0, 288], sizes = [16, 32], strides = [1, 1]} : vector<16x384xf32> to vector<16x32xf32>
    %50 = arith.truncf %49 : vector<16x32xf32> to vector<16x32xbf16>
    %cst_23 = arith.constant dense<0.000000e+00> : vector<16x16xf32>
    %51 = tpu.matmul %46, %48, %cst_23 {dimension_numbers = #tpu.dot_dimension_numbers<[1], [1], [0], [0], [0, 0, 1, 0], [], []>} : vector<16x32xbf16>, vector<16x32xbf16>, vector<16x16xf32> -> vector<16x16xf32>
    %cst_24 = arith.constant 0.176776692 : f32
    %52 = vector.broadcast %cst_24 : f32 to vector<16x16xf32>
    %53 = arith.mulf %51, %52 : vector<16x16xf32>
    %54 = vector.broadcast %5 : vector<1x16xf32> to vector<16x16xf32>
    %55 = arith.addf %53, %54 : vector<16x16xf32>
    %cst_25 = arith.constant dense<0xFF800000> : vector<16xf32>
    %56 = vector.multi_reduction <maximumf>, %55, %cst_25 [1] : vector<16x16xf32> to vector<16xf32>
    %57 = vector.shape_cast %56 : vector<16xf32> to vector<16x1xf32>
    %58 = vector.broadcast %57 : vector<16x1xf32> to vector<16x16xf32>
    %59 = arith.subf %55, %58 : vector<16x16xf32>
    %60 = math.exp %59 : vector<16x16xf32>
    %cst_26 = arith.constant dense<0.000000e+00> : vector<16xf32>
    %61 = vector.multi_reduction <add>, %60, %cst_26 [1] : vector<16x16xf32> to vector<16xf32>
    %62 = vector.shape_cast %61 : vector<16xf32> to vector<16x1xf32>
    %63 = tpu.reciprocal %62 {approx = true} : vector<16x1xf32> -> vector<16x1xf32>
    %64 = vector.broadcast %63 : vector<16x1xf32> to vector<16x16xf32>
    %65 = arith.mulf %60, %64 : vector<16x16xf32>
    %66 = arith.truncf %65 : vector<16x16xf32> to vector<16x16xbf16>
    %cst_27 = arith.constant dense<0.000000e+00> : vector<16x32xf32>
    %67 = tpu.matmul %66, %50, %cst_27 {dimension_numbers = #tpu.dot_dimension_numbers<[1], [0], [0], [1], [0, 0, 1, 1], [], []>} : vector<16x16xbf16>, vector<16x32xbf16>, vector<16x32xf32> -> vector<16x32xf32>
    %68 = arith.truncf %67 : vector<16x32xf32> to vector<16x32xbf16>
    %c0_28 = arith.constant 0 : index
    %c32 = arith.constant 32 : index
    %c0_29 = arith.constant 0 : index
    %69 = vector.load %arg9[%c0_28, %c32, %c0_29] : memref<1x128x128xbf16, #tpu.memory_space<vmem>>, vector<1x32x128xbf16>
    %70 = vector.shape_cast %69 : vector<1x32x128xbf16> to vector<32x128xbf16>
    %cst_30 = arith.constant dense<0.000000e+00> : vector<16x128xf32>
    %71 = tpu.matmul %68, %70, %cst_30 {dimension_numbers = #tpu.dot_dimension_numbers<[1], [0], [0], [1], [0, 0, 1, 1], [], []>} : vector<16x32xbf16>, vector<32x128xbf16>, vector<16x128xf32> -> vector<16x128xf32>
    %72 = arith.addf %44, %71 : vector<16x128xf32>
    %73 = vector.extract_strided_slice %13 {offsets = [0, 64], sizes = [16, 32], strides = [1, 1]} : vector<16x384xf32> to vector<16x32xf32>
    %74 = arith.truncf %73 : vector<16x32xf32> to vector<16x32xbf16>
    %75 = vector.extract_strided_slice %13 {offsets = [0, 192], sizes = [16, 32], strides = [1, 1]} : vector<16x384xf32> to vector<16x32xf32>
    %76 = arith.truncf %75 : vector<16x32xf32> to vector<16x32xbf16>
    %77 = vector.extract_strided_slice %13 {offsets = [0, 320], sizes = [16, 32], strides = [1, 1]} : vector<16x384xf32> to vector<16x32xf32>
    %78 = arith.truncf %77 : vector<16x32xf32> to vector<16x32xbf16>
    %cst_31 = arith.constant dense<0.000000e+00> : vector<16x16xf32>
    %79 = tpu.matmul %74, %76, %cst_31 {dimension_numbers = #tpu.dot_dimension_numbers<[1], [1], [0], [0], [0, 0, 1, 0], [], []>} : vector<16x32xbf16>, vector<16x32xbf16>, vector<16x16xf32> -> vector<16x16xf32>
    %cst_32 = arith.constant 0.176776692 : f32
    %80 = vector.broadcast %cst_32 : f32 to vector<16x16xf32>
    %81 = arith.mulf %79, %80 : vector<16x16xf32>
    %82 = vector.broadcast %5 : vector<1x16xf32> to vector<16x16xf32>
    %83 = arith.addf %81, %82 : vector<16x16xf32>
    %cst_33 = arith.constant dense<0xFF800000> : vector<16xf32>
    %84 = vector.multi_reduction <maximumf>, %83, %cst_33 [1] : vector<16x16xf32> to vector<16xf32>
    %85 = vector.shape_cast %84 : vector<16xf32> to vector<16x1xf32>
    %86 = vector.broadcast %85 : vector<16x1xf32> to vector<16x16xf32>
    %87 = arith.subf %83, %86 : vector<16x16xf32>
    %88 = math.exp %87 : vector<16x16xf32>
    %cst_34 = arith.constant dense<0.000000e+00> : vector<16xf32>
    %89 = vector.multi_reduction <add>, %88, %cst_34 [1] : vector<16x16xf32> to vector<16xf32>
    %90 = vector.shape_cast %89 : vector<16xf32> to vector<16x1xf32>
    %91 = tpu.reciprocal %90 {approx = true} : vector<16x1xf32> -> vector<16x1xf32>
    %92 = vector.broadcast %91 : vector<16x1xf32> to vector<16x16xf32>
    %93 = arith.mulf %88, %92 : vector<16x16xf32>
    %94 = arith.truncf %93 : vector<16x16xf32> to vector<16x16xbf16>
    %cst_35 = arith.constant dense<0.000000e+00> : vector<16x32xf32>
    %95 = tpu.matmul %94, %78, %cst_35 {dimension_numbers = #tpu.dot_dimension_numbers<[1], [0], [0], [1], [0, 0, 1, 1], [], []>} : vector<16x16xbf16>, vector<16x32xbf16>, vector<16x32xf32> -> vector<16x32xf32>
    %96 = arith.truncf %95 : vector<16x32xf32> to vector<16x32xbf16>
    %c0_36 = arith.constant 0 : index
    %c64 = arith.constant 64 : index
    %c0_37 = arith.constant 0 : index
    %97 = vector.load %arg9[%c0_36, %c64, %c0_37] : memref<1x128x128xbf16, #tpu.memory_space<vmem>>, vector<1x32x128xbf16>
    %98 = vector.shape_cast %97 : vector<1x32x128xbf16> to vector<32x128xbf16>
    %cst_38 = arith.constant dense<0.000000e+00> : vector<16x128xf32>
    %99 = tpu.matmul %96, %98, %cst_38 {dimension_numbers = #tpu.dot_dimension_numbers<[1], [0], [0], [1], [0, 0, 1, 1], [], []>} : vector<16x32xbf16>, vector<32x128xbf16>, vector<16x128xf32> -> vector<16x128xf32>
    %100 = arith.addf %72, %99 : vector<16x128xf32>
    %101 = vector.extract_strided_slice %13 {offsets = [0, 96], sizes = [16, 32], strides = [1, 1]} : vector<16x384xf32> to vector<16x32xf32>
    %102 = arith.truncf %101 : vector<16x32xf32> to vector<16x32xbf16>
    %103 = vector.extract_strided_slice %13 {offsets = [0, 224], sizes = [16, 32], strides = [1, 1]} : vector<16x384xf32> to vector<16x32xf32>
    %104 = arith.truncf %103 : vector<16x32xf32> to vector<16x32xbf16>
    %105 = vector.extract_strided_slice %13 {offsets = [0, 352], sizes = [16, 32], strides = [1, 1]} : vector<16x384xf32> to vector<16x32xf32>
    %106 = arith.truncf %105 : vector<16x32xf32> to vector<16x32xbf16>
    %cst_39 = arith.constant dense<0.000000e+00> : vector<16x16xf32>
    %107 = tpu.matmul %102, %104, %cst_39 {dimension_numbers = #tpu.dot_dimension_numbers<[1], [1], [0], [0], [0, 0, 1, 0], [], []>} : vector<16x32xbf16>, vector<16x32xbf16>, vector<16x16xf32> -> vector<16x16xf32>
    %cst_40 = arith.constant 0.176776692 : f32
    %108 = vector.broadcast %cst_40 : f32 to vector<16x16xf32>
    %109 = arith.mulf %107, %108 : vector<16x16xf32>
    %110 = vector.broadcast %5 : vector<1x16xf32> to vector<16x16xf32>
    %111 = arith.addf %109, %110 : vector<16x16xf32>
    %cst_41 = arith.constant dense<0xFF800000> : vector<16xf32>
    %112 = vector.multi_reduction <maximumf>, %111, %cst_41 [1] : vector<16x16xf32> to vector<16xf32>
    %113 = vector.shape_cast %112 : vector<16xf32> to vector<16x1xf32>
    %114 = vector.broadcast %113 : vector<16x1xf32> to vector<16x16xf32>
    %115 = arith.subf %111, %114 : vector<16x16xf32>
    %116 = math.exp %115 : vector<16x16xf32>
    %cst_42 = arith.constant dense<0.000000e+00> : vector<16xf32>
    %117 = vector.multi_reduction <add>, %116, %cst_42 [1] : vector<16x16xf32> to vector<16xf32>
    %118 = vector.shape_cast %117 : vector<16xf32> to vector<16x1xf32>
    %119 = tpu.reciprocal %118 {approx = true} : vector<16x1xf32> -> vector<16x1xf32>
    %120 = vector.broadcast %119 : vector<16x1xf32> to vector<16x16xf32>
    %121 = arith.mulf %116, %120 : vector<16x16xf32>
    %122 = arith.truncf %121 : vector<16x16xf32> to vector<16x16xbf16>
    %cst_43 = arith.constant dense<0.000000e+00> : vector<16x32xf32>
    %123 = tpu.matmul %122, %106, %cst_43 {dimension_numbers = #tpu.dot_dimension_numbers<[1], [0], [0], [1], [0, 0, 1, 1], [], []>} : vector<16x16xbf16>, vector<16x32xbf16>, vector<16x32xf32> -> vector<16x32xf32>
    %124 = arith.truncf %123 : vector<16x32xf32> to vector<16x32xbf16>
    %c0_44 = arith.constant 0 : index
    %c96 = arith.constant 96 : index
    %c0_45 = arith.constant 0 : index
    %125 = vector.load %arg9[%c0_44, %c96, %c0_45] : memref<1x128x128xbf16, #tpu.memory_space<vmem>>, vector<1x32x128xbf16>
    %126 = vector.shape_cast %125 : vector<1x32x128xbf16> to vector<32x128xbf16>
    %cst_46 = arith.constant dense<0.000000e+00> : vector<16x128xf32>
    %127 = tpu.matmul %124, %126, %cst_46 {dimension_numbers = #tpu.dot_dimension_numbers<[1], [0], [0], [1], [0, 0, 1, 1], [], []>} : vector<16x32xbf16>, vector<32x128xbf16>, vector<16x128xf32> -> vector<16x128xf32>
    %128 = arith.addf %100, %127 : vector<16x128xf32>
    %129 = arith.addf %128, %3 : vector<16x128xf32>
    %c0_47 = arith.constant 0 : index
    %c0_48 = arith.constant 0 : index
    %c0_49 = arith.constant 0 : index
    %130 = vector.load %arg11[%c0_47, %c0_48, %c0_49] : memref<1x1x128xf32, #tpu.memory_space<vmem>>, vector<1x1x128xf32>
    %131 = vector.shape_cast %130 : vector<1x1x128xf32> to vector<1x128xf32>
    %c0_50 = arith.constant 0 : index
    %c0_51 = arith.constant 0 : index
    %c0_52 = arith.constant 0 : index
    %132 = vector.load %arg12[%c0_50, %c0_51, %c0_52] : memref<1x1x128xf32, #tpu.memory_space<vmem>>, vector<1x1x128xf32>
    %133 = vector.shape_cast %132 : vector<1x1x128xf32> to vector<1x128xf32>
    %cst_53 = arith.constant dense<0.000000e+00> : vector<16xf32>
    %134 = vector.multi_reduction <add>, %129, %cst_53 [1] : vector<16x128xf32> to vector<16xf32>
    %135 = vector.shape_cast %134 : vector<16xf32> to vector<16x1xf32>
    %cst_54 = arith.constant 1.280000e+02 : f32
    %136 = vector.broadcast %cst_54 : f32 to vector<16x1xf32>
    %137 = arith.divf %135, %136 : vector<16x1xf32>
    %138 = vector.broadcast %137 : vector<16x1xf32> to vector<16x128xf32>
    %139 = arith.subf %129, %138 : vector<16x128xf32>
    %140 = arith.mulf %139, %139 : vector<16x128xf32>
    %cst_55 = arith.constant dense<0.000000e+00> : vector<16xf32>
    %141 = vector.multi_reduction <add>, %140, %cst_55 [1] : vector<16x128xf32> to vector<16xf32>
    %142 = vector.shape_cast %141 : vector<16xf32> to vector<16x1xf32>
    %cst_56 = arith.constant 1.280000e+02 : f32
    %143 = vector.broadcast %cst_56 : f32 to vector<16x1xf32>
    %144 = arith.divf %142, %143 : vector<16x1xf32>
    %145 = vector.broadcast %137 : vector<16x1xf32> to vector<16x128xf32>
    %146 = arith.subf %129, %145 : vector<16x128xf32>
    %cst_57 = arith.constant 9.99999996E-13 : f32
    %147 = vector.broadcast %cst_57 : f32 to vector<16x1xf32>
    %148 = arith.addf %144, %147 : vector<16x1xf32>
    %149 = math.rsqrt %148 : vector<16x1xf32>
    %150 = vector.broadcast %149 : vector<16x1xf32> to vector<16x128xf32>
    %151 = arith.mulf %146, %150 : vector<16x128xf32>
    %152 = vector.broadcast %131 : vector<1x128xf32> to vector<16x128xf32>
    %153 = arith.mulf %151, %152 : vector<16x128xf32>
    %154 = vector.broadcast %133 : vector<1x128xf32> to vector<16x128xf32>
    %155 = arith.addf %153, %154 : vector<16x128xf32>
    %156 = arith.truncf %155 : vector<16x128xf32> to vector<16x128xbf16>
    %c0_58 = arith.constant 0 : index
    %c0_59 = arith.constant 0 : index
    %c0_60 = arith.constant 0 : index
    %157 = vector.load %arg13[%c0_58, %c0_59, %c0_60] : memref<1x128x512xbf16, #tpu.memory_space<vmem>>, vector<1x128x512xbf16>
    %158 = vector.shape_cast %157 : vector<1x128x512xbf16> to vector<128x512xbf16>
    %cst_61 = arith.constant dense<0.000000e+00> : vector<16x512xf32>
    %159 = tpu.matmul %156, %158, %cst_61 {dimension_numbers = #tpu.dot_dimension_numbers<[1], [0], [0], [1], [0, 0, 1, 1], [], []>} : vector<16x128xbf16>, vector<128x512xbf16>, vector<16x512xf32> -> vector<16x512xf32>
    %c0_62 = arith.constant 0 : index
    %c0_63 = arith.constant 0 : index
    %c0_64 = arith.constant 0 : index
    %160 = vector.load %arg14[%c0_62, %c0_63, %c0_64] : memref<1x1x512xf32, #tpu.memory_space<vmem>>, vector<1x1x512xf32>
    %161 = vector.shape_cast %160 : vector<1x1x512xf32> to vector<1x512xf32>
    %162 = vector.broadcast %161 : vector<1x512xf32> to vector<16x512xf32>
    %163 = arith.addf %159, %162 : vector<16x512xf32>
    %cst_65 = arith.constant 5.000000e-01 : f32
    %164 = vector.broadcast %cst_65 : f32 to vector<16x512xf32>
    %165 = arith.mulf %164, %163 : vector<16x512xf32>
    %cst_66 = arith.constant 0.707106769 : f32
    %166 = vector.broadcast %cst_66 : f32 to vector<16x512xf32>
    %167 = arith.mulf %163, %166 : vector<16x512xf32>
    %168 = math.erf %167 : vector<16x512xf32>
    %cst_67 = arith.constant 1.000000e+00 : f32
    %169 = vector.broadcast %cst_67 : f32 to vector<16x512xf32>
    %170 = arith.addf %169, %168 : vector<16x512xf32>
    %171 = arith.mulf %165, %170 : vector<16x512xf32>
    %172 = arith.truncf %171 : vector<16x512xf32> to vector<16x512xbf16>
    %c0_68 = arith.constant 0 : index
    %c0_69 = arith.constant 0 : index
    %c0_70 = arith.constant 0 : index
    %173 = vector.load %arg15[%c0_68, %c0_69, %c0_70] : memref<1x512x128xbf16, #tpu.memory_space<vmem>>, vector<1x512x128xbf16>
    %174 = vector.shape_cast %173 : vector<1x512x128xbf16> to vector<512x128xbf16>
    %cst_71 = arith.constant dense<0.000000e+00> : vector<16x128xf32>
    %175 = tpu.matmul %172, %174, %cst_71 {dimension_numbers = #tpu.dot_dimension_numbers<[1], [0], [0], [1], [0, 0, 1, 1], [], []>} : vector<16x512xbf16>, vector<512x128xbf16>, vector<16x128xf32> -> vector<16x128xf32>
    %c0_72 = arith.constant 0 : index
    %c0_73 = arith.constant 0 : index
    %c0_74 = arith.constant 0 : index
    %176 = vector.load %arg16[%c0_72, %c0_73, %c0_74] : memref<1x1x128xf32, #tpu.memory_space<vmem>>, vector<1x1x128xf32>
    %177 = vector.shape_cast %176 : vector<1x1x128xf32> to vector<1x128xf32>
    %178 = vector.broadcast %177 : vector<1x128xf32> to vector<16x128xf32>
    %179 = arith.addf %175, %178 : vector<16x128xf32>
    %180 = arith.addf %179, %155 : vector<16x128xf32>
    %c0_75 = arith.constant 0 : index
    %c0_76 = arith.constant 0 : index
    %c0_77 = arith.constant 0 : index
    %181 = vector.load %arg17[%c0_75, %c0_76, %c0_77] : memref<1x1x128xf32, #tpu.memory_space<vmem>>, vector<1x1x128xf32>
    %182 = vector.shape_cast %181 : vector<1x1x128xf32> to vector<1x128xf32>
    %c0_78 = arith.constant 0 : index
    %c0_79 = arith.constant 0 : index
    %c0_80 = arith.constant 0 : index
    %183 = vector.load %arg18[%c0_78, %c0_79, %c0_80] : memref<1x1x128xf32, #tpu.memory_space<vmem>>, vector<1x1x128xf32>
    %184 = vector.shape_cast %183 : vector<1x1x128xf32> to vector<1x128xf32>
    %cst_81 = arith.constant dense<0.000000e+00> : vector<16xf32>
    %185 = vector.multi_reduction <add>, %180, %cst_81 [1] : vector<16x128xf32> to vector<16xf32>
    %186 = vector.shape_cast %185 : vector<16xf32> to vector<16x1xf32>
    %cst_82 = arith.constant 1.280000e+02 : f32
    %187 = vector.broadcast %cst_82 : f32 to vector<16x1xf32>
    %188 = arith.divf %186, %187 : vector<16x1xf32>
    %189 = vector.broadcast %188 : vector<16x1xf32> to vector<16x128xf32>
    %190 = arith.subf %180, %189 : vector<16x128xf32>
    %191 = arith.mulf %190, %190 : vector<16x128xf32>
    %cst_83 = arith.constant dense<0.000000e+00> : vector<16xf32>
    %192 = vector.multi_reduction <add>, %191, %cst_83 [1] : vector<16x128xf32> to vector<16xf32>
    %193 = vector.shape_cast %192 : vector<16xf32> to vector<16x1xf32>
    %cst_84 = arith.constant 1.280000e+02 : f32
    %194 = vector.broadcast %cst_84 : f32 to vector<16x1xf32>
    %195 = arith.divf %193, %194 : vector<16x1xf32>
    %196 = vector.broadcast %188 : vector<16x1xf32> to vector<16x128xf32>
    %197 = arith.subf %180, %196 : vector<16x128xf32>
    %cst_85 = arith.constant 9.99999996E-13 : f32
    %198 = vector.broadcast %cst_85 : f32 to vector<16x1xf32>
    %199 = arith.addf %195, %198 : vector<16x1xf32>
    %200 = math.rsqrt %199 : vector<16x1xf32>
    %201 = vector.broadcast %200 : vector<16x1xf32> to vector<16x128xf32>
    %202 = arith.mulf %197, %201 : vector<16x128xf32>
    %203 = vector.broadcast %182 : vector<1x128xf32> to vector<16x128xf32>
    %204 = arith.mulf %202, %203 : vector<16x128xf32>
    %205 = vector.broadcast %184 : vector<1x128xf32> to vector<16x128xf32>
    %206 = arith.addf %204, %205 : vector<16x128xf32>
    %c0_86 = arith.constant 0 : index
    %c0_87 = arith.constant 0 : index
    %207 = vector.load %arg21[%c0_86, %c0_87] : memref<16x128xf32, #tpu.memory_space<vmem>>, vector<16x128xf32>
    tpu.vector_store %arg21[%c0_86, %c0_87], %206 {strides = array<i32>} : memref<16x128xf32, #tpu.memory_space<vmem>>, vector<16x128xf32>,
    %c0_i32_88 = arith.constant 0 : i32
    %208 = arith.cmpi sge, %arg1, %c0_i32_88 : i32
    %209 = arith.extui %208 : i1 to i32
    %c0_i32_89 = arith.constant 0 : i32
    %210 = arith.cmpi ne, %209, %c0_i32_89 : i32
    scf.if %210 {
      %c0_91 = arith.constant 0 : index
      %c0_92 = arith.constant 0 : index
      %214 = vector.load %arg22[%c0_91, %c0_92] : memref<16x128xf32, #tpu.memory_space<vmem>>, vector<16x128xf32>
      %215 = arith.addf %214, %206 : vector<16x128xf32>
      %c0_93 = arith.constant 0 : index
      %c0_94 = arith.constant 0 : index
      %216 = vector.load %arg22[%c0_93, %c0_94] : memref<16x128xf32, #tpu.memory_space<vmem>>, vector<16x128xf32>
      tpu.vector_store %arg22[%c0_93, %c0_94], %215 {strides = array<i32>} : memref<16x128xf32, #tpu.memory_space<vmem>>, vector<16x128xf32>,
    } else {
    }
    %c1_i32 = arith.constant 1 : i32
    %211 = arith.cmpi eq, %arg1, %c1_i32 : i32
    %212 = arith.extui %211 : i1 to i32
    %c0_i32_90 = arith.constant 0 : i32
    %213 = arith.cmpi ne, %212, %c0_i32_90 : i32
    scf.if %213 {
      %c0_91 = arith.constant 0 : index
      %c0_92 = arith.constant 0 : index
      %c0_93 = arith.constant 0 : index
      %214 = vector.load %arg19[%c0_91, %c0_92, %c0_93] : memref<1x16x128xf32, #tpu.memory_space<vmem>>, vector<1x16x128xf32>
      %215 = vector.shape_cast %214 : vector<1x16x128xf32> to vector<16x128xf32>
      %216 = vector.shape_cast %206 : vector<16x128xf32> to vector<1x16x128xf32>
      tpu.vector_store %arg19[%c0_91, %c0_92, %c0_93], %216 {strides = array<i32>} : memref<1x16x128xf32, #tpu.memory_space<vmem>>, vector<1x16x128xf32>,
      %c0_94 = arith.constant 0 : index
      %c0_95 = arith.constant 0 : index
      %217 = vector.load %arg22[%c0_94, %c0_95] : memref<16x128xf32, #tpu.memory_space<vmem>>, vector<16x128xf32>
      %cst_96 = arith.constant 2.500000e-01 : f32
      %218 = vector.broadcast %cst_96 : f32 to vector<16x128xf32>
      %219 = arith.mulf %217, %218 : vector<16x128xf32>
      %c0_97 = arith.constant 0 : index
      %c0_98 = arith.constant 0 : index
      %c0_99 = arith.constant 0 : index
      %220 = vector.load %arg4[%c0_97, %c0_98, %c0_99] : memref<1x16x1xf32, #tpu.memory_space<vmem>>, vector<1x16x1xf32>
      %221 = vector.shape_cast %220 : vector<1x16x1xf32> to vector<16x1xf32>
      %222 = vector.broadcast %221 : vector<16x1xf32> to vector<16x128xf32>
      %223 = arith.mulf %219, %222 : vector<16x128xf32>
      %c0_100 = arith.constant 0 : index
      %c0_101 = arith.constant 0 : index
      %c0_102 = arith.constant 0 : index
      %224 = vector.load %arg20[%c0_100, %c0_101, %c0_102] : memref<1x16x128xf32, #tpu.memory_space<vmem>>, vector<1x16x128xf32>
      %225 = vector.shape_cast %224 : vector<1x16x128xf32> to vector<16x128xf32>
      %226 = vector.shape_cast %223 : vector<16x128xf32> to vector<1x16x128xf32>
      tpu.vector_store %arg20[%c0_100, %c0_101, %c0_102], %226 {strides = array<i32>} : memref<1x16x128xf32, #tpu.memory_space<vmem>>, vector<1x16x128xf32>,
    } else {
    }
    return
  }
  func.func @transform_0(%arg0: i32, %arg1: i32) -> (i32, i32, i32) {
    %c0_i32 = arith.constant 0 : i32
    %c0_i32_0 = arith.constant 0 : i32
    %c0_i32_1 = arith.constant 0 : i32
    return %arg0, %c0_i32, %c0_i32_0 : i32, i32, i32
  }
  func.func @transform_1(%arg0: i32, %arg1: i32) -> (i32, i32, i32) {
    %c0_i32 = arith.constant 0 : i32
    %c0_i32_0 = arith.constant 0 : i32
    %c0_i32_1 = arith.constant 0 : i32
    return %arg0, %c0_i32, %c0_i32_0 : i32, i32, i32
  }
  func.func @transform_2(%arg0: i32, %arg1: i32) -> (i32, i32, i32) {
    %c0_i32 = arith.constant 0 : i32
    %c0_i32_0 = arith.constant 0 : i32
    %c0_i32_1 = arith.constant 0 : i32
    return %arg0, %c0_i32, %c0_i32_0 : i32, i32, i32
  }
  func.func @transform_3(%arg0: i32, %arg1: i32) -> (i32, i32) {
    %c0_i32 = arith.constant 0 : i32
    %c0_i32_0 = arith.constant 0 : i32
    %c0_i32_1 = arith.constant 0 : i32
    return %c0_i32, %c0_i32_0 : i32, i32
  }
  func.func @transform_4(%arg0: i32, %arg1: i32) -> (i32, i32) {
    %c0_i32 = arith.constant 0 : i32
    %c0_i32_0 = arith.constant 0 : i32
    %c0_i32_1 = arith.constant 0 : i32
    return %c0_i32, %c0_i32_0 : i32, i32
  }
  func.func @transform_5(%arg0: i32, %arg1: i32) -> (i32, i32, i32) {
    %c0_i32 = arith.constant 0 : i32
    %c0_i32_0 = arith.constant 0 : i32
    %c0_i32_1 = arith.constant 0 : i32
    return %arg1, %c0_i32, %c0_i32_0 : i32, i32, i32
  }
  func.func @transform_6(%arg0: i32, %arg1: i32) -> (i32, i32, i32) {
    %c0_i32 = arith.constant 0 : i32
    %c0_i32_0 = arith.constant 0 : i32
    %c0_i32_1 = arith.constant 0 : i32
    return %arg1, %c0_i32, %c0_i32_0 : i32, i32, i32
  }
  func.func @transform_7(%arg0: i32, %arg1: i32) -> (i32, i32, i32) {
    %c0_i32 = arith.constant 0 : i32
    %c0_i32_0 = arith.constant 0 : i32
    %c0_i32_1 = arith.constant 0 : i32
    return %arg1, %c0_i32, %c0_i32_0 : i32, i32, i32
  }
  func.func @transform_8(%arg0: i32, %arg1: i32) -> (i32, i32, i32) {
    %c0_i32 = arith.constant 0 : i32
    %c0_i32_0 = arith.constant 0 : i32
    %c0_i32_1 = arith.constant 0 : i32
    return %arg1, %c0_i32, %c0_i32_0 : i32, i32, i32
  }
  func.func @transform_9(%arg0: i32, %arg1: i32) -> (i32, i32, i32) {
    %c0_i32 = arith.constant 0 : i32
    %c0_i32_0 = arith.constant 0 : i32
    %c0_i32_1 = arith.constant 0 : i32
    return %arg1, %c0_i32, %c0_i32_0 : i32, i32, i32
  }
  func.func @transform_10(%arg0: i32, %arg1: i32) -> (i32, i32, i32) {
    %c0_i32 = arith.constant 0 : i32
    %c0_i32_0 = arith.constant 0 : i32
    %c0_i32_1 = arith.constant 0 : i32
    return %arg1, %c0_i32, %c0_i32_0 : i32, i32, i32
  }
  func.func @transform_11(%arg0: i32, %arg1: i32) -> (i32, i32, i32) {
    %c0_i32 = arith.constant 0 : i32
    %c0_i32_0 = arith.constant 0 : i32
    %c0_i32_1 = arith.constant 0 : i32
    return %arg1, %c0_i32, %c0_i32_0 : i32, i32, i32
  }
  func.func @transform_12(%arg0: i32, %arg1: i32) -> (i32, i32, i32) {
    %c0_i32 = arith.constant 0 : i32
    %c0_i32_0 = arith.constant 0 : i32
    %c0_i32_1 = arith.constant 0 : i32
    return %arg1, %c0_i32, %c0_i32_0 : i32, i32, i32
  }
  func.func @transform_13(%arg0: i32, %arg1: i32) -> (i32, i32, i32) {
    %c0_i32 = arith.constant 0 : i32
    %c0_i32_0 = arith.constant 0 : i32
    %c0_i32_1 = arith.constant 0 : i32
    return %arg1, %c0_i32, %c0_i32_0 : i32, i32, i32
  }
  func.func @transform_14(%arg0: i32, %arg1: i32) -> (i32, i32, i32) {
    %c0_i32 = arith.constant 0 : i32
    %c0_i32_0 = arith.constant 0 : i32
    %c0_i32_1 = arith.constant 0 : i32
    return %arg1, %c0_i32, %c0_i32_0 : i32, i32, i32
  }
  func.func @transform_15(%arg0: i32, %arg1: i32) -> (i32, i32, i32) {
    %c0_i32 = arith.constant 0 : i32
    %c0_i32_0 = arith.constant 0 : i32
    %c0_i32_1 = arith.constant 0 : i32
    return %arg1, %c0_i32, %c0_i32_0 : i32, i32, i32
  }
  func.func @transform_16(%arg0: i32, %arg1: i32) -> (i32, i32, i32) {
    %c0_i32 = arith.constant 0 : i32
    %c0_i32_0 = arith.constant 0 : i32
    %c0_i32_1 = arith.constant 0 : i32
    return %arg1, %c0_i32, %c0_i32_0 : i32, i32, i32
  }
  func.func @transform_17(%arg0: i32, %arg1: i32) -> (i32, i32, i32) {
    %c0_i32 = arith.constant 0 : i32
    %c0_i32_0 = arith.constant 0 : i32
    %c0_i32_1 = arith.constant 0 : i32
    return %arg0, %c0_i32, %c0_i32_0 : i32, i32, i32
  }
  func.func @transform_18(%arg0: i32, %arg1: i32) -> (i32, i32, i32) {
    %c0_i32 = arith.constant 0 : i32
    %c0_i32_0 = arith.constant 0 : i32
    %c0_i32_1 = arith.constant 0 : i32
    return %arg0, %c0_i32, %c0_i32_0 : i32, i32, i32
  }
}

</mosaic_0001>

<bundles_post_ra>
// kernel: bert_forward.1
= control target key start
LH: loop header
LB: loop body
LE: loop exit
PB: predicated region body
PF: predicated region fallthrough
CT: control target
= control target key end

     0   :  { %s5031_s0 = inlined_call_operand.vmem [shape: f32[2,16,128], index: 0, kind: input, shape index: {}]   ;;  %s5032_s1 = inlined_call_operand.vmem [shape: f32[2,1,16], index: 1, kind: input, shape index: {}]   ;;  %s5033_s2 = inlined_call_operand.vmem [shape: f32[2,16,1], index: 2, kind: input, shape index: {}]   ;;  %s5034_s3 = inlined_call_operand.vmem [shape: f32[1,128], index: 3, kind: input, shape index: {}]   ;;  %s5035_s4 = inlined_call_operand.vmem [shape: f32[1,128], index: 4, kind: input, shape index: {}]   ;;  %s5036_s5 = inlined_call_operand.hbm [shape: bf16[2,128,384], index: 5, kind: input, shape index: {}]   ;;  %s5037_s6 = inlined_call_operand.vmem [shape: f32[2,1,384], index: 6, kind: input, shape index: {}]   ;;  %s5038_s7 = inlined_call_operand.hbm [shape: bf16[2,128,128], index: 7, kind: input, shape index: {}]   ;;  %s5039_s8 = inlined_call_operand.vmem [shape: f32[2,1,128], index: 8, kind: input, shape index: {}]   ;;  %s5040_s9 = inlined_call_operand.vmem [shape: f32[2,1,128], index: 9, kind: input, shape index: {}]   ;;  %s5041_s10 = inlined_call_operand.hbm [shape: f32[2,1,128], index: 10, kind: input, shape index: {}]   ;;  %s5042_s11 = inlined_call_operand.vmem [shape: bf16[2,128,512], index: 11, kind: input, shape index: {}]   ;;  %s5043_s12 = inlined_call_operand.vmem [shape: f32[2,1,512], index: 12, kind: input, shape index: {}]   ;;  %s5044_s13 = inlined_call_operand.hbm [shape: bf16[2,512,128], index: 13, kind: input, shape index: {}]   ;;  %s5045_s14 = inlined_call_operand.vmem [shape: f32[2,1,128], index: 14, kind: input, shape index: {}]   ;;  %s5046_s15 = inlined_call_operand.hbm [shape: f32[2,1,128], index: 15, kind: input, shape index: {}]   ;;  %s5047_s16 = inlined_call_operand.hbm [shape: f32[2,1,128], index: 16, kind: input, shape index: {}]   ;;  %s5048_s17 = inlined_call_operand.hbm [shape: f32[2,16,128], index: 17, kind: output, shape index: {0}]   ;;  %s5049_s18 = inlined_call_operand.hbm [shape: f32[2,16,128], index: 18, kind: output, shape index: {1}]  }
   0x1   :  { %5072 = sst [smem:[#allocation41_spill]] %s5031_s0 }
   0x2   :  { %5073 = sst [smem:[#allocation42_spill]] %s5032_s1 }
   0x3   :  { %5074 = sst [smem:[#allocation43_spill]] %s5033_s2 }
   0x4   :  { %5075 = sst [smem:[#allocation44_spill]] %s5034_s3 }
   0x5   :  { %5076 = sst [smem:[#allocation45_spill]] %s5035_s4 }
   0x6   :  { %5077 = sst [smem:[#allocation46_spill]] %s5036_s5 }
   0x7   :  { %5078 = sst [smem:[#allocation47_spill]] %s5037_s6 }
   0x8   :  { %5079 = sst [smem:[#allocation48_spill]] %s5038_s7 }
   0x9   :  { %5080 = sst [smem:[#allocation49_spill]] %s5039_s8 }
   0xa   :  { %5081 = sst [smem:[#allocation50_spill]] %s5040_s9 }
   0xb   :  { %5082 = sst [smem:[#allocation51_spill]] %s5041_s10 }
   0xc   :  { %5083 = sst [smem:[#allocation52_spill]] %s5042_s11 }
   0xd   :  { %5084 = sst [smem:[#allocation53_spill]] %s5043_s12 }
   0xe   :  { %5085 = sst [smem:[#allocation54_spill]] %s5044_s13 }
   0xf   :  { %5086 = sst [smem:[#allocation55_spill]] %s5045_s14 }
  0x10   :  { %5087 = sst [smem:[#allocation56_spill]] %s5046_s15 }
  0x11   :  { %5088 = sst [smem:[#allocation57_spill]] %s5047_s16 }
  0x12   :  { %5089 = sst [smem:[#allocation58_spill]] %s5048_s17 }
  0x13   :  { %5090 = sst [smem:[#allocation59_spill]] %s5049_s18 }
  0x14   :  { %24 = vsyncpa [#allocation5], 0 }
  0x15   :  { %26 = vsyncpa [#allocation5 + $0x1], 0 }
  0x16   :  { %27 = vsyncpa [#allocation8], 0 }
  0x17   :  { %29 = vsyncpa [#allocation8 + $0x1], 0 }
  0x18   :  { %30 = vsyncpa [#allocation11], 0 }
  0x19   :  { %32 = vsyncpa [#allocation11 + $0x1], 0 }
  0x1a   :  { %33 = vsyncpa [#allocation14], 0 }
  0x1b   :  { %35 = vsyncpa [#allocation14 + $0x1], 0 }
  0x1c   :  { %36 = vsyncpa [#allocation6], 0 }
  0x1d   :  { %38 = vsyncpa [#allocation6 + $0x1], 0 }
  0x1e   :  { %39 = vsyncpa [#allocation17], 0 }
  0x1f   :  { %41 = vsyncpa [#allocation17 + $0x1], 0  ;;  %s4308_s27 = smov 0   ;;  %s4310_s28 = smov 0  }
  0x20   :  { %s4312_s29 = smov 0   ;;  %s4314_s30 = smov 0  }
  0x21   :  { %s4316_s0 = smov 0   ;;  %s4318_s19 = smov 0  }
  0x22   :  { %s4320_s1 = smov 0   ;;  %s4322_s20 = smov 0  }
  0x23   :  { %s4324_s21 = smov 0   ;;  %s4326_s22 = smov 0  }
  0x24   :  { %s4328_s2 = smov 0  }
  0x25 LB: > { %5091 = sst [smem:[#allocation24_spill]] %s4149_s27  ;;  %s4362_s23 = sadd.s32 4294967295, %s4189_s2   ;;  %s4189_s2 = sphi %s4328_s2, %s47_s2   ;;  %s4185_s22 = sphi %s4326_s22, %s5163_s22   ;;  %s4181_s21 = sphi %s4324_s21, %s5162_s21   ;;  %s4177_s20 = sphi %s4322_s20, %s5161_s20   ;;  %s4173_s1 = sphi %s4320_s1, %s5160_s1   ;;  %s4169_s19 = sphi %s4318_s19, %s5159_s19   ;;  %s4165_s0 = sphi %s4316_s0, %s5158_s0   ;;  %s4161_s30 = sphi %s4314_s30, %s5157_s30   ;;  %s4157_s29 = sphi %s4312_s29, %s5156_s29   ;;  %s4153_s28 = sphi %s4310_s28, %s5155_s28   ;;  %s4149_s27 = sphi %s4308_s27, %s5154_s27  }
  0x26   : > { %5092 = sst [smem:[#allocation25_spill]] %s4153_s28  ;;  %s3187_s24 = sadd.s32 4294967294, %s4189_s2  }
  0x27   : > { %5093 = sst [smem:[#allocation26_spill]] %s4157_s29  ;;  %s56_s25 = sadd.s32 1, %s4181_s21 }
  0x28   : > { %5094 = sst [smem:[#allocation27_spill]] %s4165_s0  ;;  %s59_s26 = sadd.s32 1, %s4185_s22 }
  0x29   : > { %5095 = sst [smem:[#allocation28_spill]] %s4169_s19  ;;  %p57_p0 = scmp.ge.s32.totalorder %s56_s25, 2 }
  0x2a   : > { %5096 = sst [smem:[#allocation29_spill]] %s4173_s1  ;;  %s186_s18 = sadd.s32 1, %s4169_s19 }
  0x2b   : > { %5097 = sst [smem:[#allocation30_spill]] %s4177_s20  ;;  %p193_p1 = scmp.ne.s32.totalorder %s4169_s19, %s4165_s0 }
  0x2c   : > { %5098 = sst [smem:[#allocation31_spill]] %s4181_s21  ;;  %p194_p2 = scmp.eq.s32.totalorder %s4189_s2, 0 }
  0x2d   : > { %5099 = sst [smem:[#allocation32_spill]] %s4185_s22  ;;  %s5165_s25 = smov (%p57_p0, %s56_s25), 0 }
  0x2e   : > { %5100 = sst [smem:[#allocation33_spill]] %s4189_s2  ;;  %s5167_s26 = smov (!%p57_p0, %s59_s26), %s4185_s22 }
  0x2f   : > { %5101 = sst [smem:[#allocation34_spill]] %s5165_s25  ;;  %s183_s17 = ssub.s32 %s4181_s21, %s5165_s25 }
  0x30   : > { %p4376_p3 = por %p194_p2, %p193_p1  ;;  %p61_p4 = scmp.ge.s32.totalorder %s5167_s26, 2 }
  0x31   : > { %p184_p5 = scmp.eq.s32.totalorder %s183_s17, 0  ;;  %p199_p6 = scmp.ne.s32.totalorder %s4165_s0, %s4161_s30 }
  0x32   : > { %p200_p7 = scmp.eq.s32.totalorder %s4362_s23, 0  ;;  %s5169_s26 = smov (%p61_p4, %s5167_s26), 0 }
  0x33   : > { %5103 = sst [smem:[#allocation35_spill]] %s5169_s26  ;;  %s495_s12 = ssub.s32 %s4185_s22, %s5169_s26 }
  0x34   : > { %s4385_s3 = scalar_select %p184_p5, %s4169_s19, %s186_s18  }
  0x35   : > { %p4387_p8 = por %p200_p7, %p199_p6  ;;  %p496_p9 = scmp.eq.s32.totalorder %s495_s12, 0 }
  0x36   : > { %5104 = sst [smem:[#allocation36_spill]] %s4385_s3  ;;  %s498_s14 = sadd.s32 1, %s4157_s29 }
  0x37   : > { %p508_p10 = scmp.ne.s32.totalorder %s4157_s29, %s4153_s28  ;;  %p509_p11 = scmp.eq.s32.totalorder %s4362_s23, 3 }
  0x38   : > { %s4398_s17 = scalar_select %p496_p9, %s4157_s29, %s498_s14  }
  0x39   : > { %p4400_p12 = por %p509_p11, %p508_p10  ;;  %p514_p13 = scmp.ne.s32.totalorder %s4153_s28, %s4149_s27 }
  0x3a   : > { %5106 = sst [smem:[#allocation37_spill]] %s4398_s17  ;;  %p515_p0 = scmp.eq.s32.totalorder %s3187_s24, 3 }
  0x3b   : > { %s5107_s30 = scalar_select %p4400_p12, 1, 0 }
  0x3c   : > { %p3574_p1 = scmp.lt.s32.totalorder %s4189_s2, 4  ;;  %s4408_s18 = sand.u32 1, %s4169_s19  }
  0x3d   : > { %5108 = sst [smem:[#allocation38_spill]] %s5107_s30  ;;  %p4410_p2 = por %p515_p0, %p514_p13 }
  0x3e   : > { %s5061_s12 = sand.u32 1, %s4189_s2   ;;  %p4417_p4 = pnand %p3574_p1, %p4376_p3 }
  0x3f   : > { %s5109_s26 = scalar_select %p4410_p2, 1, 0 }
  0x40   : > { %s3191_s22 = sshll.u32 %s4408_s18, 6  ;;  %s3340_s3 = sshll.u32 %s4181_s21, 10 }
  0x41   : > { %5110 = sst [smem:[#allocation39_spill]] %s5109_s26  ;;  %s621_s19 = scalar_lea.vmem [#allocation7], %s3191_s22 }
  0x42   : > { %s5112_s7 = sld [smem:[#allocation48_spill]]  ;;  %s628_s27 = sshll.u32 %s621_s19, 4  ;;  %s629_s27 = int_to_ptr.vmem [resolvable:$true] %s628_s27 }
  0x43   : > { %p3200_p5 = scmp.ge.s32.totalorder %s4189_s2, 1  ;;  %s4429_s30 = scalar_lea.sflag [#allocation8], %s5061_s12 }
  0x44   : > { %p4433_p6 = pneg %p4417_p4  ;;  %s3872_s26 = scalar_lea.vmem %s629_s27, 1024 }
  0x45   : > { %p3873_p3 = scmp.ne.s32.totalorder %s629_s27, %s3872_s26  ;;  %s4191_s29 = smov [#allocation7]  }
  0x47   : > { %p3875_p7 = pnand %p3873_p3, %p4433_p6 }
  0x48   : > { %s627_s24 = scalar_lea.hbm %s5112_s7, %s3340_s3  ;;  %s3877_s3 = sshll.u32 %s4191_s29, 4  ;;  %s3878_s3 = int_to_ptr.vmem [resolvable:$false] %s3877_s3 }
  0x49   : > { %p3876_p9 = pneg %p3875_p7  ;;  %s3879_s19 = scalar_lea.vmem %s3878_s3, 2048 }
  0x4a   : > { %p3880_p10 = scmp.lt.s32.totalorder %s629_s27, %s3878_s3  ;;  %p3881_p11 = scmp.lt.s32.totalorder %s3879_s19, %s3872_s26 }
  0x4c   : > { %p3882_p13 = por %p3881_p11, %p3880_p10 }
  0x4e   : > { %p3883_p0 = pnand %p3882_p13, %p3876_p9 }
  0x50   : > { %3886 = shalt.err (!%p3883_p0)
}
  0x51   : > { %s4192_s22 = smov 64   ;;  %s4193_s17 = smov 4  }
  0x52   : > { %3554 = dma.hbm_to_vmem [thread:$0]  (!%p4417_p4), %s627_s24, 1024, %s629_s27, %s4429_s30, %s4192_s22, %s4192_s22, %s4193_s17  }
  0x53   : > { %p741_p1 = scmp.lt.s32.totalorder %s4189_s2, 5  ;;  %s3195_s29 = sshll.u32 %s4408_s18, 8 }
  0x54   : > { %s3341_s12 = sshll.u32 %s4181_s21, 12  ;;  %s5115_s13 = sld [smem:[#allocation54_spill]] }
  0x55   : > { %p4447_p3 = pnand %p3200_p5, %p741_p1  ;;  %s686_s11 = scalar_lea.vmem [#allocation10], %s3195_s29 }
  0x56   : > { %s693_s6 = sshll.u32 %s686_s11, 4  ;;  %s5116_s9 = sand.u32 1, %s4189_s2   ;;  %s694_s6 = int_to_ptr.vmem [resolvable:$true] %s693_s6 }
  0x57   : > { %s4456_s8 = scalar_lea.sflag [#allocation11], %s5116_s9  ;;  %s3900_s1 = scalar_lea.vmem %s694_s6, 4096 }
  0x58   : > { %p3901_p7 = scmp.ne.s32.totalorder %s694_s6, %s3900_s1  ;;  %s4194_s27 = smov [#allocation10]  }
  0x59   : > { %s3905_s24 = sshll.u32 %s4194_s27, 4  ;;  %s3906_s24 = int_to_ptr.vmem [resolvable:$false] %s3905_s24 }
  0x5a   : > { %s692_s7 = scalar_lea.hbm %s5115_s13, %s3341_s12  ;;  %p3903_p9 = pnand %p3901_p7, %p4433_p6 }
  0x5b   : > { %s3907_s20 = scalar_lea.vmem %s3906_s24, 8192  ;;  %p3908_p5 = scmp.lt.s32.totalorder %s694_s6, %s3906_s24 }
  0x5c   : > { %p3904_p10 = pneg %p3903_p9  ;;  %p3909_p11 = scmp.lt.s32.totalorder %s3907_s20, %s3900_s1 }
  0x5e   : > { %p3910_p13 = por %p3909_p11, %p3908_p5 }
  0x60   : > { %p3911_p0 = pnand %p3910_p13, %p3904_p10 }
  0x62   : > { %3914 = shalt.err (!%p3911_p0)
}
  0x63   : > { %3560 = dma.hbm_to_vmem [thread:$0]  (!%p4417_p4), %s692_s7, 4096, %s694_s6, %s4456_s8, %s4192_s22, %s4192_s22, %s4193_s17  }
  0x64   : > { %s3528_s9 = smul.u32 192, %s4408_s18  ;;  %s5117_s5 = sld [smem:[#allocation46_spill]] }
  0x65   : > { %s3529_s11 = smul.u32 3072, %s4181_s21  ;;  %s4469_s20 = sshll.u32 %s4181_s21, 4 }
  0x66   : > { %s593_s19 = scalar_lea.vmem [#allocation4], %s3528_s9  ;;  %s590_s27 = scalar_lea.sflag [#allocation5], %s4408_s18 }
  0x67   : > { %s600_s1 = sshll.u32 %s593_s19, 4  ;;  %s4195_s13 = smov [#allocation4]   ;;  %s601_s1 = int_to_ptr.vmem [resolvable:$true] %s600_s1 }
  0x68   : > { %s3928_s24 = scalar_lea.vmem %s601_s1, 3072  ;;  %s3933_s2 = sshll.u32 %s4195_s13, 4  ;;  %s3934_s2 = int_to_ptr.vmem [resolvable:$false] %s3933_s2 }
  0x69   : > { %p3929_p1 = scmp.ne.s32.totalorder %s601_s1, %s3928_s24  ;;  %s3935_s6 = scalar_lea.vmem %s3934_s2, 6144 }
  0x6a   : > { %s599_s3 = scalar_lea.hbm %s5117_s5, %s3529_s11  ;;  %p3936_p10 = scmp.lt.s32.totalorder %s601_s1, %s3934_s2 }
  0x6b   : > { %p3931_p7 = pnand %p3929_p1, %p4433_p6  ;;  %p3937_p5 = scmp.lt.s32.totalorder %s3935_s6, %s3928_s24 }
  0x6d   : > { %p3932_p9 = pneg %p3931_p7  ;;  %p3938_p11 = por %p3937_p5, %p3936_p10 }
  0x6f   : > { %p3939_p13 = pnand %p3938_p11, %p3932_p9 }
  0x71   : > { %3942 = shalt.err (!%p3939_p13)
}
  0x72   : > { %s4196_s7 = smov 192   ;;  %s4197_s22 = smov 12  }
  0x73   : > { %3551 = dma.hbm_to_vmem [thread:$0]  (!%p4417_p4), %s599_s3, 3072, %s601_s1, %s590_s27, %s4196_s7, %s4196_s7, %s4197_s22  }
  0x74   : > { %s5118_s10 = sld [smem:[#allocation51_spill]]  ;;  %s653_s13 = scalar_lea.vmem [#allocation9], %s4408_s18 }
  0x75   : > { %s660_s12 = sshll.u32 %s653_s13, 4  ;;  %s4198_s29 = smov [#allocation9]   ;;  %s661_s12 = int_to_ptr.vmem [resolvable:$true] %s660_s12 }
  0x76   : > { %s3956_s2 = scalar_lea.vmem %s661_s12, 16  ;;  %s3961_s19 = sshll.u32 %s4198_s29, 4  ;;  %s3962_s19 = int_to_ptr.vmem [resolvable:$false] %s3961_s19 }
  0x77   : > { %p3957_p0 = scmp.ne.s32.totalorder %s661_s12, %s3956_s2  ;;  %s3963_s24 = scalar_lea.vmem %s3962_s19, 32 }
  0x78   : > { %p3964_p9 = scmp.lt.s32.totalorder %s661_s12, %s3962_s19  ;;  %p3965_p10 = scmp.lt.s32.totalorder %s3963_s24, %s3956_s2 }
  0x79   : > { %p3959_p1 = pnand %p3957_p0, %p4433_p6 }
  0x7a   : > { %s658_s11 = scalar_lea.hbm %s5118_s10, %s4469_s20  ;;  %p3966_p5 = por %p3965_p10, %p3964_p9 }
  0x7b   : > { %p3960_p7 = pneg %p3959_p1 }
  0x7d   : > { %p3967_p11 = pnand %p3966_p5, %p3960_p7 }
  0x7f   : > { %3970 = shalt.err (!%p3967_p11)
}
  0x80   : > { %3557 = dma.hbm_to_vmem [thread:$0]  (!%p4417_p4), %s658_s11, 16, %s661_s12, %s4429_s30  }
  0x81   : > { %s5119_s15 = sld [smem:[#allocation56_spill]]  ;;  %s712_s6 = scalar_lea.vmem [#allocation12], %s4408_s18 }
  0x82   : > { %s719_s7 = sshll.u32 %s712_s6, 4  ;;  %s4199_s17 = smov [#allocation12]   ;;  %s720_s7 = int_to_ptr.vmem [resolvable:$true] %s719_s7 }
  0x83   : > { %s3984_s22 = scalar_lea.vmem %s720_s7, 16  ;;  %s3989_s9 = sshll.u32 %s4199_s17, 4  ;;  %s3990_s9 = int_to_ptr.vmem [resolvable:$false] %s3989_s9 }
  0x84   : > { %p3985_p13 = scmp.ne.s32.totalorder %s720_s7, %s3984_s22  ;;  %s3991_s13 = scalar_lea.vmem %s3990_s9, 32 }
  0x85   : > { %p3992_p7 = scmp.lt.s32.totalorder %s720_s7, %s3990_s9  ;;  %p3993_p9 = scmp.lt.s32.totalorder %s3991_s13, %s3984_s22 }
  0x86   : > { %p3987_p0 = pnand %p3985_p13, %p4433_p6 }
  0x87   : > { %s717_s27 = scalar_lea.hbm %s5119_s15, %s4469_s20  ;;  %p3994_p10 = por %p3993_p9, %p3992_p7 }
  0x88   : > { %p3988_p1 = pneg %p3987_p0 }
  0x8a   : > { %p3995_p5 = pnand %p3994_p10, %p3988_p1 }
  0x8c   : > { %3998 = shalt.err (!%p3995_p5)
}
  0x8d   : > { %3563 = dma.hbm_to_vmem [thread:$0]  (!%p4417_p4), %s717_s27, 16, %s720_s7, %s4456_s8  }
  0x8e   : > { %s5120_s16 = sld [smem:[#allocation57_spill]]  ;;  %s729_s2 = scalar_lea.vmem [#allocation13], %s4408_s18 }
  0x8f   : > { %s736_s29 = sshll.u32 %s729_s2, 4  ;;  %s727_s19 = scalar_lea.sflag [#allocation14], %s4408_s18  ;;  %s737_s29 = int_to_ptr.vmem [resolvable:$true] %s736_s29 }
  0x90   : > { %s4012_s24 = scalar_lea.vmem %s737_s29, 16  ;;  %s4200_s3 = smov [#allocation13]  }
  0x91   : > { %p4013_p11 = scmp.ne.s32.totalorder %s737_s29, %s4012_s24  ;;  %s4017_s1 = sshll.u32 %s4200_s3, 4  ;;  %s4018_s1 = int_to_ptr.vmem [resolvable:$false] %s4017_s1 }
  0x92   : > { %s4019_s6 = scalar_lea.vmem %s4018_s1, 32  ;;  %p4020_p1 = scmp.lt.s32.totalorder %s737_s29, %s4018_s1 }
  0x93   : > { %p4015_p13 = pnand %p4013_p11, %p4433_p6  ;;  %p4021_p7 = scmp.lt.s32.totalorder %s4019_s6, %s4012_s24 }
  0x94   : > { %s734_s12 = scalar_lea.hbm %s5120_s16, %s4469_s20 }
  0x95   : > { %p4016_p0 = pneg %p4015_p13  ;;  %p4022_p9 = por %p4021_p7, %p4020_p1 }
  0x97   : > { %p4023_p10 = pnand %p4022_p9, %p4016_p0 }
  0x99   : > { %4026 = shalt.err (!%p4023_p10)
}
  0x9a   : > { %3566 = dma.hbm_to_vmem [thread:$0]  (!%p4417_p4), %s734_s12, 16, %s737_s29, %s727_s19  }
  0x9b   : > { %745 = sbr.rel (%p4447_p3) target bundleno = 4480 (0x1180), region = 88 }
  0xa0   : > { %s4509_s8 = sand.u32 1, %s4165_s0  }
  0xa1   : > { %s3530_s18 = smul.u32 192, %s4509_s8  ;;  %s748_s4 = scalar_lea.sflag [#allocation5], %s4509_s8 }
  0xa3   : > { %s4513_s20 = scalar_lea.vmem [#allocation4], %s3530_s18 }
  0xa4   : > { %4124 = dma.done.wait (%p4387_p8), %s748_s4, 3072  }
  0xa5   : > { %4126 = vsyncadd (%p4387_p8), %s748_s4, 4294964224  ;;  %s756_s14 = sand.u32 1, %s4362_s23   ;;  %s3201_s26 = sshll.u32 %s4509_s8, 6 }
  0xa6   : > { %s757_s27 = scalar_lea.sflag [#allocation8], %s756_s14  ;;  %s4521_s7 = scalar_lea.vmem [#allocation7], %s3201_s26 }
  0xa7   : > { %4128 = dma.done.wait (%p4387_p8), %s757_s27, 1040  }
  0xa8   : > { %4130 = vsyncadd (%p4387_p8), %s757_s27, 4294966256  ;;  %s3202_s22 = sshll.u32 %s4509_s8, 8  ;;  %s774_s9 = scalar_lea.sflag [#allocation11], %s756_s14 }
  0xa9   : > { %s4529_s13 = scalar_lea.vmem [#allocation10], %s3202_s22 }
  0xaa   : > { %4132 = dma.done.wait (%p4387_p8), %s774_s9, 4112  }
  0xab   : > { %4134 = vsyncadd (%p4387_p8), %s774_s9, 4294963184  ;;  %s791_s30 = scalar_lea.sflag [#allocation14], %s4509_s8 }
  0xac   : > { %4136 = dma.done.wait (%p4387_p8), %s791_s30, 16  }
  0xad   : > { %4138 = vsyncadd (%p4387_p8), %s791_s30, 4294967280  ;;  %s5121_s12 = sld [smem:[#allocation30_spill]]  ;;  %s4543_s29 = sand.u32 1, %s4153_s28  }
  0xae   : > { %s5122_s2 = sld [smem:[#allocation29_spill]]  ;;  %s3203_s19 = sshll.u32 %s4543_s29, 4 }
  0xaf   : > { %5123 = sst [smem:[#allocation40_spill]] %s4543_s29  ;;  %s4597_s21 = scalar_lea.vmem [#allocation15], %s3203_s19 }
  0xb0   : > { %s5125_s26 = sld [smem:[#allocation41_spill]]  ;;  %s4599_s1 = scalar_lea.vmem [#allocation16], %s3203_s19 }
  0xb1   : > { %s5126_s30 = sld [smem:[#allocation43_spill]] }
  0xb2   : > { %s5128_s0 = sld [smem:[#allocation50_spill]] }
  0xb3   : > { %p908_p4 = scmp.lt.s32.totalorder %s5121_s12, 1  ;;  %s5129_s18 = sld [smem:[#allocation47_spill]] }
  0xb4   : > { %p921_p6 = scmp.lt.s32.totalorder %s5122_s2, 1  ;;  %s5130_s22 = sld [smem:[#allocation52_spill]] }
  0xb5   : > { %s5171_s12 = smov (!%p908_p4, %s5121_s12), 1  ;;  %s5131_s5 = sld [smem:[#allocation55_spill]] }
  0xb6   : > { %s4552_s24 = scalar_select %p921_p6, %s5122_s2, 1 }
  0xb7   : > { %s3342_s25 = sshll.u32 %s5171_s12, 4  ;;  %s5132_s16 = sld [smem:[#allocation53_spill]] }
  0xb8   : > { %s912_s27 = scalar_lea.vmem %s5125_s26, %s3342_s25  ;;  %s4565_s11 = scalar_lea.vmem %s5126_s30, %s3342_s25 }
  0xb9   : > { %s3531_s23 = smul.u32 3, %s4552_s24  ;;  %s930_s28 = scalar_lea.vmem %s5128_s0, %s4552_s24 }
  0xba   : > { %s3344_s3 = sshll.u32 %s4552_s24, 8  ;;  %s3211_s9 = sshll.u32 %s4552_s24, 2 }
  0xbb   : > { %s4580_s4 = scalar_lea.vmem %s5129_s18, %s3531_s23  ;;  %s4585_s25 = scalar_lea.vmem %s5130_s22, %s3344_s3 }
  0xbc   : > { %s942_s10 = scalar_lea.vmem %s5131_s5, %s4552_s24  ;;  %p3212_p8 = scmp.ne.s32.totalorder %s5122_s2, 0 }
  0xbd   : > { %s4595_s0 = scalar_lea.vmem %s5132_s16, %s3211_s9  ;;  %s5133_s2 = sld [smem:[#allocation44_spill]] (!%p3212_p8) }
  0xbe   : > { %947 = sbr.rel (%p3212_p8) target bundleno = 507 (0x1fb), region = 116  ;;  %s5134_s18 = sld [smem:[#allocation45_spill]] (!%p3212_p8) }
  0xc3   : > { %v948_v0 = vld [vmem:[%s912_s27] sm:$0xff]  ;;  %v949_v1 = vld [vmem:[%s912_s27 + $0x8] sm:$0xff]  ;;  %v4201_v10 = vmov 0.0  }
  0xc4   : > { %952 = vadd.xlane.f32.xlu0 %v948_v0  ;;  %993 = vst [vmem:[#allocation3 + $0x8] sm:$0xff] %v4201_v10  ;;  %994 = vst [vmem:[#allocation3] sm:$0xff] %v4201_v10  ;;  %v3213_v18 = vld [vmem:[%s5133_s2] ss:$0 sm:$0xff] }
  0xc5   : > { %v3214_v20 = vld [vmem:[%s5134_s18] ss:$0 sm:$0xff] }
  0xc8   : > { %954 = vadd.xlane.f32.xlu0 %v949_v1 }
 0x14d   : > { %v953_v2 = vpop.xlane.xlu0 %952 }
 0x14e   : > { %v957_v3 = vmul.f32 0.0078125, %v953_v2 }
 0x150   : > { %v959_v4 = vsub.f32 %v948_v0, %v957_v3 }
 0x151   : > { %v955_v5 = vpop.xlane.xlu0 %954 }
 0x152   : > { %v958_v6 = vmul.f32 0.0078125, %v955_v5  ;;  %v961_v7 = vmul.f32 %v959_v4, %v959_v4 }
 0x154   : > { %v960_v8 = vsub.f32 %v949_v1, %v958_v6  ;;  %963 = vadd.xlane.f32.xlu1 %v961_v7 }
 0x156   : > { %v962_v9 = vmul.f32 %v960_v8, %v960_v8 }
 0x158   : > { %965 = vadd.xlane.f32.xlu1 %v962_v9 }
 0x1dd   : > { %v964_v11 = vpop.xlane.xlu1 %963 }
 0x1de   : > { %v967_v12 = vmul.f32 0.0078125, %v964_v11 }
 0x1e0   : > { %v969_v13 = vadd.f32 1e-12, %v967_v12 }
 0x1e1   : > { %v966_v14 = vpop.xlane.xlu1 %965 }
 0x1e2   : > { %3678 = vrsqrt.f32 %v969_v13  ;;  %v968_v15 = vmul.f32 0.0078125, %v966_v14 }
 0x1e4   : > { %v970_v16 = vadd.f32 1e-12, %v968_v15 }
 0x1e6   : > { %3680 = vrsqrt.f32 %v970_v16 }
 0x1ef   : > { %v3679_v17 = vpop.eup %3678 }
 0x1f0   : > { %v973_v19 = vmul.f32 %v3679_v17, %v959_v4 }
 0x1f2   : > { %v981_v21 = vmul.f32 %v3213_v18, %v973_v19 }
 0x1f3   : > { %v3681_v22 = vpop.eup %3680 }
 0x1f4   : > { %v989_v23 = vadd.f32 %v3214_v20, %v981_v21  ;;  %v974_v24 = vmul.f32 %v3681_v22, %v960_v8 }
 0x1f6   : > { %991 = vst [vmem:[#allocation2] sm:$0xff] %v989_v23  ;;  %v982_v25 = vmul.f32 %v3213_v18, %v974_v24 }
 0x1f8   : > { %v990_v26 = vadd.f32 %v3214_v20, %v982_v25 }
 0x1fa   : > { %992 = vst [vmem:[#allocation2 + $0x8] sm:$0xff] %v990_v26 }
 0x1fb PF: > { %v3682_v27 = vld [vmem:[%s4513_s20 + $0xac] ss:$12 sps:$4 sm:$0xff]   ;;  %v3684_v28 = vld [vmem:[%s4513_s20 + $0xa8] ss:$12 sps:$4 sm:$0xff]   ;;  %v4202_v29 = vmov 0   ;;  %v4203_v47 = vmov 0.0   ;;  %v1033_v48 = vlaneseq }
 0x1fc   : > { %1208 = vmatprep.mubr.bf16.mxu0 %v4202_v29  ;;  %1176 = vmatprep.subr.bf16.mxu0 %v3682_v27  ;;  %v3685_v30 = vld [vmem:[%s4513_s20 + $0x94] ss:$12 sps:$4 sm:$0xff]   ;;  %v3687_v31 = vld [vmem:[%s4513_s20 + $0x90] ss:$12 sps:$4 sm:$0xff]   ;;  %v3690_v33 = vld [vmem:[%s4513_s20 + $0x78] ss:$12 sps:$4 sm:$0xff]  }
 0x1fd   : > { %1177 = vmatpush1.bf16.msra.mxu0 %v3684_v28  ;;  %v3688_v32 = vld [vmem:[%s4513_s20 + $0x7c] ss:$12 sps:$4 sm:$0xff]   ;;  %v3691_v34 = vld [vmem:[%s4513_s20 + $0x64] ss:$12 sps:$4 sm:$0xff]   ;;  %v3693_v35 = vld [vmem:[%s4513_s20 + $0x60] ss:$12 sps:$4 sm:$0xff]   ;;  %3428 = vmatprep.subr.bf16.mxu1 %v4203_v47 }
 0x1fe   : > { %1178 = vmatprep.subr.bf16.mxu0 %v3685_v30  ;;  %v3694_v36 = vld [vmem:[%s4513_s20 + $0x4c] ss:$12 sps:$4 sm:$0xff]   ;;  %v3696_v37 = vld [vmem:[%s4513_s20 + $0x48] ss:$12 sps:$4 sm:$0xff]   ;;  %v3699_v39 = vld [vmem:[%s4513_s20 + $0x30] ss:$12 sps:$4 sm:$0xff]  }
 0x1ff   : > { %v3697_v38 = vld [vmem:[%s4513_s20 + $0x34] ss:$12 sps:$4 sm:$0xff]   ;;  %v3700_v40 = vld [vmem:[%s4513_s20 + $0x1c] ss:$12 sps:$4 sm:$0xff]   ;;  %v3702_v41 = vld [vmem:[%s4513_s20 + $0x18] ss:$12 sps:$4 sm:$0xff]  }
 0x200   : > { %v3703_v42 = vld [vmem:[%s4513_s20 + $0x4] ss:$12 sps:$4 sm:$0xff]   ;;  %v3705_v43 = vld [vmem:[%s4513_s20] ss:$12 sps:$4 sm:$0xff]   ;;  %vm4204_vm0 = vmmov 0   ;;  %v4637_v49 = vshrl.u32 %v1033_v48, 7 }
 0x201   : > { %1179 = vmatpush1.bf16.msra.mxu0 %v3687_v31  ;;  %v4625_v44 = vld [vmem:[#allocation2] sm:$0xff]  ;;  %v4627_v45 = vld [vmem:[#allocation2 + $0x8] sm:$0xff]  ;;  %3444 = vmatprep.mubr.msk.bf16.mxu1 %vm4204_vm0, %v4203_v47  ;;  %vm1264_vm1 = vcmask 261120   ;;  %v3706_v2 = vld [vmem:[%s4513_s20 + $0xb0] ss:$12 sps:$4 sm:$0xff]   ;;  %s5135_s6 = sld [smem:[#allocation42_spill]] }
 0x202   : > { %1180 = vmatprep.subr.bf16.mxu0 %v3688_v32  ;;  %v998_v46 = vpack.c.bf16 %v4627_v45, %v4625_v44  ;;  %v1039_v50 = vsub.s32 1, %v4637_v49  ;;  %v4641_v52 = vld [vmem:[%s4580_s4] sm:$0x7]  ;;  %v1035_v57 = vsub.s32 0, %v4637_v49  ;;  %3429 = vmatpush3.bf16.msra.mxu1 %v3706_v2  ;;  %v3707_v3 = vld [vmem:[%s4513_s20 + $0x98] ss:$12 sps:$4 sm:$0xff]  }
 0x203   : > { %3430 = vmatprep.subr.bf16.mxu1 %v4203_v47  ;;  %v3708_v4 = vld [vmem:[%s4513_s20 + $0x80] ss:$12 sps:$4 sm:$0xff]   ;;  %v3709_v5 = vld [vmem:[%s4513_s20 + $0x68] ss:$12 sps:$4 sm:$0xff]   ;;  %v3710_v6 = vld [vmem:[%s4513_s20 + $0x50] ss:$12 sps:$4 sm:$0xff]  }
 0x204   : > { %v1040_v54 = vrot.slane %v4641_v52, %v1039_v50  ;;  %v1036_v61 = vrot.slane %v4641_v52, %v1035_v57  ;;  %v3711_v7 = vld [vmem:[%s4513_s20 + $0x38] ss:$12 sps:$4 sm:$0xff]   ;;  %v3712_v8 = vld [vmem:[%s4513_s20 + $0x20] ss:$12 sps:$4 sm:$0xff]   ;;  %v3713_v9 = vld [vmem:[%s4513_s20 + $0x8] ss:$12 sps:$4 sm:$0xff]  }
 0x205   : > { %1181 = vmatpush1.bf16.msra.mxu0 %v3690_v33  ;;  %vm1322_vm2 = vcmask 130048   ;;  %s4205_s20 = smov 96   ;;  %v1043_v32 = vsub.s32 2, %v4637_v49  ;;  %s4207_s14 = smov 32  }
 0x206   : > { %1182 = vmatprep.subr.bf16.mxu0 %v3691_v34  ;;  %3431 = vmatpush3.bf16.msra.mxu1 %v3707_v3  ;;  %s5137_s9 = sld [smem:[#allocation49_spill]]  ;;  %s5140_s17 = scalar_lea.vmem [#allocation9], %s4509_s8 }
 0x207   : > { %3432 = vmatprep.subr.bf16.mxu1 %v4203_v47  ;;  %s5136_s4 = scalar_lea.vmem %s5135_s6, %s5171_s12  ;;  %v1044_v34 = vrot.slane %v4641_v52, %v1043_v32  ;;  %s4206_s12 = smov 64  }
 0x208   : > { %v4684_v11 = vld [vmem:[%s5136_s4] ss:$0 sm:$0xff] }
 0x209   : > { %1183 = vmatpush1.bf16.msra.mxu0 %v3693_v35 }
 0x20a   : > { %1184 = vmatprep.subr.bf16.mxu0 %v3694_v36  ;;  %3433 = vmatpush3.bf16.msra.mxu1 %v3708_v4 }
 0x20b   : > { %3434 = vmatprep.subr.bf16.mxu1 %v4203_v47 }
 0x20c   : > { %s5138_s30 = scalar_lea.vmem %s5137_s9, %s4552_s24  ;;  %s5142_s24 = scalar_lea.vmem [#allocation12], %s4509_s8 }
 0x20d   : > { %1185 = vmatpush1.bf16.msra.mxu0 %v3696_v37 }
 0x20e   : > { %1186 = vmatprep.subr.bf16.mxu0 %v3697_v38  ;;  %3435 = vmatpush3.bf16.msra.mxu1 %v3709_v5 }
 0x20f   : > { %3436 = vmatprep.subr.bf16.mxu1 %v4203_v47 }
 0x211   : > { %1187 = vmatpush1.bf16.msra.mxu0 %v3699_v39 }
 0x212   : > { %1188 = vmatprep.subr.bf16.mxu0 %v3700_v40  ;;  %3437 = vmatpush3.bf16.msra.mxu1 %v3710_v6 }
 0x213   : > { %3438 = vmatprep.subr.bf16.mxu1 %v4203_v47 }
 0x215   : > { %1189 = vmatpush1.bf16.msra.mxu0 %v3702_v41 }
 0x216   : > { %1190 = vmatprep.subr.bf16.mxu0 %v3703_v42  ;;  %3439 = vmatpush3.bf16.msra.mxu1 %v3711_v7 }
 0x217   : > { %3440 = vmatprep.subr.bf16.mxu1 %v4203_v47 }
 0x219   : > { %1191 = vmatpush1.bf16.msra.mxu0 %v3705_v43 }
 0x21a   : > { %3448 = vmatprep.subr.bf16.mxu0 %v4203_v47  ;;  %3441 = vmatpush3.bf16.msra.mxu1 %v3712_v8 }
 0x21b   : > { %3442 = vmatprep.subr.bf16.mxu1 %v4203_v47 }
 0x21c   : > { %1209 = vmatmul.mubr.bf16.vlgmr.msra.gmra.mxu0 %v998_v46 }
 0x21d   : > { %3450 = vmatprep.mubr.msk.bf16.mxu0 %vm4204_vm0, %v4203_v47 }
 0x21e   : > { %3443 = vmatpush3.bf16.msra.mxu1 %v3713_v9 }
 0x21f   : > { %3454 = vmatprep.subr.bf16.mxu1 %v4203_v47 }
 0x221   : > { %3445 = vmatmul.mubr.bf16.vlgmr.msra.gmra.mxu1 %v998_v46 }
 0x222   : > { %3456 = vmatprep.mubr.msk.bf16.mxu1 %vm4204_vm0, %v4203_v47 }
 0x2dc   : > { %v1210_v51 = vpop.f32.mrf.mxu0 }
 0x2dd   : > { %v1211_v0 = vadd.f32 %v1210_v51, %v1036_v61 }
 0x2de   : > { %v1212_v53 = vpop.f32.mrf.mxu0 }
 0x2df   : > { %v1213_v58 = vadd.f32 %v1212_v53, %v1040_v54 }
 0x2e0   : > { %v1214_v55 = vpop.f32.mrf.mxu0 }
 0x2e1   : > { %v1215_v63 = vadd.f32 %v1214_v55, %v1036_v61  ;;  %v1253_v33 = vpop.f32.mrf.mxu1 }
 0x2e2   : > { %v1216_v56 = vpop.f32.mrf.mxu0  ;;  %v1254_v36 = vadd.f32 %v1253_v33, %v1044_v34 }
 0x2e3   : > { %v1217_v59 = vadd.f32 %v1216_v56, %v1040_v54  ;;  %v4655_v1 = vpack.c.bf16 %v1215_v63, %v1211_v0  ;;  %v3446_v35 = vpop.f32.mrf.mxu1  ;;  %v3714_v56 = vld [vmem:[%s4521_s7 + $0x8] sm:$0xff]  }
 0x2e5   : > { %v4647_v60 = vpack.c.bf16 %v1217_v59, %v1213_v58  ;;  %v1256_v37 = vpop.f32.mrf.mxu1  ;;  %v3715_v58 = vld [vmem:[%s4521_s7] sm:$0xff]  }
 0x2e6   : > { %v1257_v38 = vadd.f32 %v1256_v37, %v1044_v34 }
 0x2e7   : > { %v1269_v62 = vsel %vm1264_vm1, %v4647_v60, 0  ;;  %v3447_v39 = vpop.f32.mrf.mxu1 }
 0x2e8   : > { %3449 = vmatpush3.bf16.xpose.msra.mxu0 %v1269_v62  ;;  %v4698_v40 = vpack.c.bf16 %v1257_v38, %v1254_v36 }
 0x2e9   : > { %3460 = vmatprep.subr.bf16.mxu0 %v4203_v47 }
 0x2ea   : > { %3455 = vmatpush3.bf16.msra.mxu1 %v4698_v40 }
 0x2eb   : > { %3468 = vmatprep.subr.bf16.mxu1 %v4203_v47 }
 0x2ef   : > { %3451 = vmatmul.mubr.msk.bf16.vlgmr.msra.gmra.mxu0 %vm1264_vm1, %v4655_v1 }
 0x2f0   : > { %3464 = vmatprep.mubr.msk.bf16.mxu0 %vm4204_vm0, %v4203_v47  ;;  %3461 = vmatpush3.bf16.msra.mxu0 %v3714_v56 }
 0x2f1   : > { %3462 = vmatprep.subr.bf16.mxu0 %v4203_v47 }
 0x2f4   : > { %3463 = vmatpush3.bf16.msra.mxu0 %v3715_v58 }
 0x2f5   : > { %3474 = vmatprep.subr.bf16.mxu0 %v4203_v47 }
 0x3af   : > { %v1305_v10 = vpop.f32.mrf.mxu0 }
 0x3b0   : > { %v1312_v12 = vmul.f32 0.17677669, %v1305_v10 }
 0x3b1   : > { %v3452_v13 = vpop.f32.mrf.mxu0 }
 0x3b2   : > { %v1320_v14 = vadd.f32 %v4684_v11, %v1312_v12 }
 0x3b3   : > { %v1308_v15 = vpop.f32.mrf.mxu0 }
 0x3b4   : > { %v1313_v16 = vmul.f32 0.17677669, %v1308_v15  ;;  %v1323_v17 = vsel %vm1322_vm2, %v1320_v14, -inf }
 0x3b5   : > { %1324 = vmax.xlane.f32.xlu0 %v1323_v17  ;;  %v3453_v18 = vpop.f32.mrf.mxu0 }
 0x3b6   : > { %v1321_v19 = vadd.f32 %v4684_v11, %v1313_v16 }
 0x3b8   : > { %v1326_v20 = vsel %vm1322_vm2, %v1321_v19, -inf }
 0x3b9   : > { %1327 = vmax.xlane.f32.xlu0 %v1326_v20 }
 0x3cf   : > { %1463 = vrot.lane.b32.xlu0 %v4647_v60, %s4205_s20 }
 0x43e   : > { %v1325_v21 = vpop.xlane.xlu0 %1324 }
 0x43f   : > { %v1329_v22 = vsub.f32 %v1320_v14, %v1325_v21 }
 0x441   : > { %v1331_v23 = vmul.f32 1.442695, %v1329_v22 }
 0x442   : > { %v1328_v24 = vpop.xlane.xlu0 %1327 }
 0x443   : > { %3802 = vpow2.f32 %v1331_v23  ;;  %v1330_v25 = vsub.f32 %v1321_v19, %v1328_v24 }
 0x445   : > { %v1333_v26 = vmul.f32 1.442695, %v1330_v25 }
 0x446   : > { %v1464_v52 = vpop.permute.xlu0 %1463 }
 0x447   : > { %3804 = vpow2.f32 %v1333_v26  ;;  %v1469_v54 = vsel %vm1264_vm1, %v1464_v52, 0 }
 0x450   : > { %v3803_v27 = vpop.eup %3802 }
 0x451   : > { %v1335_v28 = vsel %vm1322_vm2, %v3803_v27, 0.0 }
 0x452   : > { %1336 = vadd.xlane.f32.xlu1 %v1335_v28 }
 0x454   : > { %v3805_v30 = vpop.eup %3804 }
 0x455   : > { %v1338_v31 = vsel %vm1322_vm2, %v3805_v30, 0.0 }
 0x456   : > { %1339 = vadd.xlane.f32.xlu1 %v1338_v31 }
 0x467   : > { %1460 = vrot.lane.b32.xlu1 %v4655_v1, %s4205_s20 }
 0x4db   : > { %v1337_v41 = vpop.xlane.xlu1 %1336 }
 0x4dc   : > { %3806 = vrcp.f32 %v1337_v41  ;;  %v3716_v41 = vld [vmem:[%s4521_s7 + $0x18] sm:$0xff]  }
 0x4df   : > { %v1340_v42 = vpop.xlane.xlu1 %1339 }
 0x4e0   : > { %3808 = vrcp.f32 %v1340_v42  ;;  %v3717_v42 = vld [vmem:[%s4521_s7 + $0x10] sm:$0xff]  }
 0x4e3   : > { %v1461_v55 = vpop.permute.xlu1 %1460 }
 0x4e9   : > { %v3807_v43 = vpop.eup %3806 }
 0x4ea   : > { %v1343_v48 = vmul.f32 %v3807_v43, %v3803_v27 }
 0x4ed   : > { %v3809_v46 = vpop.eup %3808 }
 0x4ee   : > { %v1344_v51 = vmul.f32 %v3809_v46, %v3805_v30 }
 0x4f0   : > { %v1345_v53 = vpack.c.bf16 %v1344_v51, %v1343_v48 }
 0x4f2   : > { %3457 = vmatmul.mubr.msk.bf16.vlgmr.msra.gmra.mxu1 %vm1322_vm2, %v1345_v53 }
 0x4f3   : > { %3469 = vmatpush3.bf16.xpose.msra.mxu1 %v1469_v54  ;;  %3470 = vmatprep.mubr.msk.bf16.mxu1 %vm4204_vm0, %v4203_v47 }
 0x4f4   : > { %3480 = vmatprep.subr.bf16.mxu1 %v4203_v47 }
 0x4fa   : > { %3471 = vmatmul.mubr.msk.bf16.vlgmr.msra.gmra.mxu1 %vm1264_vm1, %v1461_v55 }
 0x4fb   : > { %3484 = vmatprep.mubr.msk.bf16.mxu1 %vm4204_vm0, %v4203_v47  ;;  %3481 = vmatpush3.bf16.msra.mxu1 %v3716_v41 }
 0x4fc   : > { %3482 = vmatprep.subr.bf16.mxu1 %v4203_v47 }
 0x4ff   : > { %3483 = vmatpush3.bf16.msra.mxu1 %v3717_v42 }
 0x500   : > { %3494 = vmatprep.subr.bf16.mxu1 %v4203_v47 }
 0x5b2   : > { %v1383_v59 = vpop.f32.mrf.mxu1 }
 0x5b4   : > { %v3458_v61 = vpop.f32.mrf.mxu1 }
 0x5b6   : > { %v1386_v62 = vpop.f32.mrf.mxu1 }
 0x5b7   : > { %v1390_v63 = vpack.c.bf16 %v1386_v62, %v1383_v59 }
 0x5b8   : > { %v3459_v0 = vpop.f32.mrf.mxu1 }
 0x5b9   : > { %3465 = vmatmul.mubr.msk.bf16.vlgmr.msra.gmra.mxu0 %vm1264_vm1, %v1390_v63 }
 0x5ba   : > { %v1505_v2 = vpop.f32.mrf.mxu1  ;;  %3476 = vmatprep.mubr.msk.bf16.mxu0 %vm4204_vm0, %v4203_v47 }
 0x5bb   : > { %v1512_v3 = vmul.f32 0.17677669, %v1505_v2 }
 0x5bc   : > { %v3472_v4 = vpop.f32.mrf.mxu1 }
 0x5bd   : > { %v1514_v5 = vadd.f32 %v4684_v11, %v1512_v3 }
 0x5be   : > { %v1508_v6 = vpop.f32.mrf.mxu1 }
 0x5bf   : > { %v1513_v7 = vmul.f32 0.17677669, %v1508_v6  ;;  %v1516_v8 = vsel %vm1322_vm2, %v1514_v5, -inf }
 0x5c0   : > { %1517 = vmax.xlane.f32.xlu1 %v1516_v8  ;;  %v3473_v9 = vpop.f32.mrf.mxu1 }
 0x5c1   : > { %v1515_v10 = vadd.f32 %v4684_v11, %v1513_v7 }
 0x5c3   : > { %v1519_v12 = vsel %vm1322_vm2, %v1515_v10, -inf }
 0x5c4   : > { %1520 = vmax.xlane.f32.xlu0 %v1519_v12 }
 0x649   : > { %v1518_v13 = vpop.xlane.xlu1 %1517 }
 0x64a   : > { %v1522_v14 = vsub.f32 %v1514_v5, %v1518_v13  ;;  %v3245_v13 = vld [vmem:[%s5138_s30] ss:$0 sm:$0xff] }
 0x64c   : > { %v1524_v15 = vmul.f32 1.442695, %v1522_v14 }
 0x64d   : > { %v1521_v16 = vpop.xlane.xlu0 %1520 }
 0x64e   : > { %3810 = vpow2.f32 %v1524_v15  ;;  %v1523_v17 = vsub.f32 %v1515_v10, %v1521_v16 }
 0x650   : > { %v1526_v18 = vmul.f32 1.442695, %v1523_v17 }
 0x652   : > { %3812 = vpow2.f32 %v1526_v18 }
 0x65b   : > { %v3811_v19 = vpop.eup %3810 }
 0x65c   : > { %v1528_v20 = vsel %vm1322_vm2, %v3811_v19, 0.0 }
 0x65d   : > { %1529 = vadd.xlane.f32.xlu0 %v1528_v20 }
 0x65f   : > { %v3813_v21 = vpop.eup %3812 }
 0x660   : > { %v1531_v22 = vsel %vm1322_vm2, %v3813_v21, 0.0 }
 0x661   : > { %1532 = vadd.xlane.f32.xlu1 %v1531_v22 }
 0x672   : > { %1652 = vrot.lane.b32.xlu1 %v4647_v60, %s4206_s12 }
 0x673   : > { %1540 = vrot.lane.b32.xlu0 %v4698_v40, %s4205_s20 }
 0x676   : > { %1650 = vrot.lane.b32.xlu1 %v4655_v1, %s4206_s12 }
 0x679   : > { %v4731_v23 = vpop.f32.mrf.mxu0 }
 0x67a   : > { %v1457_v14 = vadd.f32 %v3245_v13, %v4731_v23 }
 0x67b   : > { %v3466_v24 = vpop.f32.mrf.mxu0 }
 0x67d   : > { %v4733_v25 = vpop.f32.mrf.mxu0 }
 0x67e   : > { %v1458_v18 = vadd.f32 %v3245_v13, %v4733_v25 }
 0x67f   : > { %v3467_v26 = vpop.f32.mrf.mxu0 }
 0x6e6   : > { %v1530_v27 = vpop.xlane.xlu0 %1529 }
 0x6e7   : > { %3814 = vrcp.f32 %v1530_v27 }
 0x6ea   : > { %v1533_v28 = vpop.xlane.xlu1 %1532  ;;  %v1541_v30 = vpop.permute.xlu0 %1540 }
 0x6eb   : > { %3816 = vrcp.f32 %v1533_v28  ;;  %3475 = vmatpush3.bf16.msra.mxu0 %v1541_v30 }
 0x6ec   : > { %3488 = vmatprep.subr.bf16.mxu0 %v4203_v47 }
 0x6ee   : > { %v1653_v36 = vpop.permute.xlu1 %1652 }
 0x6ef   : > { %v1658_v38 = vsel %vm1264_vm1, %v1653_v36, 0 }
 0x6f2   : > { %v1651_v39 = vpop.permute.xlu1 %1650 }
 0x6f4   : > { %v3815_v31 = vpop.eup %3814 }
 0x6f5   : > { %v1536_v34 = vmul.f32 %v3815_v31, %v3811_v19 }
 0x6f8   : > { %v3817_v33 = vpop.eup %3816 }
 0x6f9   : > { %v1537_v35 = vmul.f32 %v3817_v33, %v3813_v21  ;;  %v3718_v33 = vld [vmem:[%s4521_s7 + $0x28] sm:$0xff]  }
 0x6fb   : > { %v1538_v37 = vpack.c.bf16 %v1537_v35, %v1536_v34  ;;  %v3719_v34 = vld [vmem:[%s4521_s7 + $0x20] sm:$0xff]  }
 0x6fd   : > { %3477 = vmatmul.mubr.msk.bf16.vlgmr.msra.gmra.mxu0 %vm1322_vm2, %v1538_v37 }
 0x6fe   : > { %3489 = vmatpush3.bf16.xpose.msra.mxu0 %v1658_v38  ;;  %3490 = vmatprep.mubr.msk.bf16.mxu0 %vm4204_vm0, %v4203_v47 }
 0x6ff   : > { %3500 = vmatprep.subr.bf16.mxu0 %v4203_v47 }
 0x705   : > { %3491 = vmatmul.mubr.msk.bf16.vlgmr.msra.gmra.mxu0 %vm1264_vm1, %v1651_v39 }
 0x706   : > { %3504 = vmatprep.mubr.msk.bf16.mxu0 %vm4204_vm0, %v4203_v47  ;;  %3501 = vmatpush3.bf16.msra.mxu0 %v3718_v33  ;;  %v3724_v33 = vld [vmem:[%s4585_s25 + $0xe4] ss:$16 sps:$4 sm:$0xff]  }
 0x707   : > { %3502 = vmatprep.subr.bf16.mxu0 %v4203_v47 }
 0x70a   : > { %3503 = vmatpush3.bf16.msra.mxu0 %v3719_v34  ;;  %v3725_v34 = vld [vmem:[%s4585_s25 + $0xe8] ss:$16 sps:$4 sm:$0xff]  }
 0x70b   : > { %3514 = vmatprep.subr.bf16.mxu0 %v4203_v47 }
 0x7bd   : > { %v1580_v43 = vpop.f32.mrf.mxu0 }
 0x7bf   : > { %v3478_v46 = vpop.f32.mrf.mxu0 }
 0x7c1   : > { %v1583_v48 = vpop.f32.mrf.mxu0 }
 0x7c2   : > { %v1587_v51 = vpack.c.bf16 %v1583_v48, %v1580_v43 }
 0x7c3   : > { %v3479_v52 = vpop.f32.mrf.mxu0 }
 0x7c4   : > { %3485 = vmatmul.mubr.msk.bf16.vlgmr.msra.gmra.mxu1 %vm1264_vm1, %v1587_v51 }
 0x7c5   : > { %v1694_v53 = vpop.f32.mrf.mxu0  ;;  %3496 = vmatprep.mubr.msk.bf16.mxu1 %vm4204_vm0, %v4203_v47 }
 0x7c6   : > { %v1701_v54 = vmul.f32 0.17677669, %v1694_v53 }
 0x7c7   : > { %v3492_v55 = vpop.f32.mrf.mxu0 }
 0x7c8   : > { %v1703_v56 = vadd.f32 %v4684_v11, %v1701_v54 }
 0x7c9   : > { %v1697_v58 = vpop.f32.mrf.mxu0 }
 0x7ca   : > { %v1702_v59 = vmul.f32 0.17677669, %v1697_v58  ;;  %v1705_v61 = vsel %vm1322_vm2, %v1703_v56, -inf }
 0x7cb   : > { %1706 = vmax.xlane.f32.xlu1 %v1705_v61  ;;  %v3493_v62 = vpop.f32.mrf.mxu0 }
 0x7cc   : > { %v1704_v63 = vadd.f32 %v4684_v11, %v1702_v59 }
 0x7ce   : > { %v1708_v0 = vsel %vm1322_vm2, %v1704_v63, -inf }
 0x7cf   : > { %1709 = vmax.xlane.f32.xlu0 %v1708_v0 }
 0x7dc   : > { %1728 = vrot.lane.b32.xlu1 %v4698_v40, %s4206_s12 }
 0x7e0   : > { %1838 = vrot.lane.b32.xlu1 %v4655_v1, %s4207_s14 }
 0x854   : > { %v1707_v2 = vpop.xlane.xlu1 %1706 }
 0x855   : > { %v1711_v3 = vsub.f32 %v1703_v56, %v1707_v2 }
 0x857   : > { %v1713_v4 = vmul.f32 1.442695, %v1711_v3 }
 0x858   : > { %v1729_v5 = vpop.permute.xlu1 %1728  ;;  %v1710_v6 = vpop.xlane.xlu0 %1709 }
 0x859   : > { %3818 = vpow2.f32 %v1713_v4  ;;  %v1712_v7 = vsub.f32 %v1704_v63, %v1710_v6  ;;  %3495 = vmatpush3.bf16.msra.mxu1 %v1729_v5 }
 0x85a   : > { %3508 = vmatprep.subr.bf16.mxu1 %v4203_v47 }
 0x85b   : > { %v1715_v8 = vmul.f32 1.442695, %v1712_v7 }
 0x85c   : > { %v1839_v25 = vpop.permute.xlu1 %1838 }
 0x85d   : > { %3820 = vpow2.f32 %v1715_v8 }
 0x866   : > { %v3819_v9 = vpop.eup %3818 }
 0x867   : > { %v1717_v10 = vsel %vm1322_vm2, %v3819_v9, 0.0 }
 0x868   : > { %1718 = vadd.xlane.f32.xlu0 %v1717_v10 }
 0x86a   : > { %v3821_v12 = vpop.eup %3820 }
 0x86b   : > { %v1720_v1 = vsel %vm1322_vm2, %v3821_v12, 0.0 }
 0x86c   : > { %1721 = vadd.xlane.f32.xlu0 %v1720_v1 }
 0x882   : > { %1840 = vrot.lane.b32.xlu0 %v4647_v60, %s4207_s14 }
 0x884   : > { %v1641_v15 = vpop.f32.mrf.mxu1 }
 0x885   : > { %v4770_v16 = vadd.f32 %v1641_v15, %v1457_v14 }
 0x886   : > { %v3486_v17 = vpop.f32.mrf.mxu1 }
 0x888   : > { %v1644_v19 = vpop.f32.mrf.mxu1 }
 0x889   : > { %v4773_v20 = vadd.f32 %v1644_v19, %v1458_v18  ;;  %v3721_v18 = vld [vmem:[%s4521_s7 + $0x30] sm:$0xff]  }
 0x88a   : > { %v3487_v21 = vpop.f32.mrf.mxu1 }
 0x8f1   : > { %v1719_v22 = vpop.xlane.xlu0 %1718 }
 0x8f2   : > { %3822 = vrcp.f32 %v1719_v22 }
 0x8f5   : > { %v1722_v24 = vpop.xlane.xlu0 %1721 }
 0x8f6   : > { %3824 = vrcp.f32 %v1722_v24 }
 0x8f9   : > { %v1841_v28 = vpop.permute.xlu0 %1840 }
 0x8fa   : > { %v1846_v31 = vsel %vm1264_vm1, %v1841_v28, 0 }
 0x8ff   : > { %v3823_v26 = vpop.eup %3822 }
 0x900   : > { %v1725_v60 = vmul.f32 %v3823_v26, %v3819_v9 }
 0x903   : > { %v3825_v27 = vpop.eup %3824 }
 0x904   : > { %v1726_v23 = vmul.f32 %v3825_v27, %v3821_v12 }
 0x906   : > { %v1727_v30 = vpack.c.bf16 %v1726_v23, %v1725_v60 }
 0x908   : > { %3497 = vmatmul.mubr.msk.bf16.vlgmr.msra.gmra.mxu1 %vm1322_vm2, %v1727_v30 }
 0x909   : > { %3509 = vmatpush3.bf16.xpose.msra.mxu1 %v1846_v31  ;;  %3510 = vmatprep.mubr.msk.bf16.mxu1 %vm4204_vm0, %v4203_v47 }
 0x90a   : > { %3520 = vmatprep.subr.bf16.mxu1 %v4203_v47 }
 0x910   : > { %3511 = vmatmul.mubr.msk.bf16.vlgmr.msra.gmra.mxu1 %vm1264_vm1, %v1839_v25  ;;  %v3722_v25 = vld [vmem:[%s4585_s25 + $0xe0] ss:$16 sps:$4 sm:$0xff]  }
 0x911   : > { %3524 = vmatprep.mubr.msk.bf16.mxu1 %vm4204_vm0, %v4203_v47 }
 0x9c8   : > { %v1768_v35 = vpop.f32.mrf.mxu1 }
 0x9ca   : > { %v3498_v36 = vpop.f32.mrf.mxu1 }
 0x9cc   : > { %v1771_v37 = vpop.f32.mrf.mxu1 }
 0x9cd   : > { %v1775_v38 = vpack.c.bf16 %v1771_v37, %v1768_v35  ;;  %v3727_v35 = vld [vmem:[%s4585_s25 + $0xec] ss:$16 sps:$4 sm:$0xff]  }
 0x9ce   : > { %v3499_v39 = vpop.f32.mrf.mxu1 }
 0x9cf   : > { %3505 = vmatmul.mubr.msk.bf16.vlgmr.msra.gmra.mxu0 %vm1264_vm1, %v1775_v38 }
 0x9d0   : > { %v1882_v41 = vpop.f32.mrf.mxu1  ;;  %3516 = vmatprep.mubr.msk.bf16.mxu0 %vm4204_vm0, %v4203_v47 }
 0x9d1   : > { %v1889_v42 = vmul.f32 0.17677669, %v1882_v41 }
 0x9d2   : > { %v3512_v43 = vpop.f32.mrf.mxu1 }
 0x9d3   : > { %v1891_v46 = vadd.f32 %v4684_v11, %v1889_v42  ;;  %v3730_v42 = vld [vmem:[%s4585_s25 + $0xc4] ss:$16 sps:$4 sm:$0xff]   ;;  %v3733_v43 = vld [vmem:[%s4585_s25 + $0xcc] ss:$16 sps:$4 sm:$0xff]  }
 0x9d4   : > { %v1885_v48 = vpop.f32.mrf.mxu1 }
 0x9d5   : > { %v1890_v51 = vmul.f32 0.17677669, %v1885_v48  ;;  %v1893_v52 = vsel %vm1322_vm2, %v1891_v46, -inf  ;;  %v3731_v48 = vld [vmem:[%s4585_s25 + $0xc8] ss:$16 sps:$4 sm:$0xff]  }
 0x9d6   : > { %1894 = vmax.xlane.f32.xlu1 %v1893_v52  ;;  %v3513_v53 = vpop.f32.mrf.mxu1  ;;  %v3739_v52 = vld [vmem:[%s4585_s25 + $0xac] ss:$16 sps:$4 sm:$0xff]  }
 0x9d7   : > { %v1892_v54 = vadd.f32 %v4684_v11, %v1890_v51  ;;  %v3736_v51 = vld [vmem:[%s4585_s25 + $0xa4] ss:$16 sps:$4 sm:$0xff]   ;;  %v3734_v53 = vld [vmem:[%s4585_s25 + $0xa0] ss:$16 sps:$4 sm:$0xff]  }
 0x9d9   : > { %v1896_v55 = vsel %vm1322_vm2, %v1892_v54, -inf }
 0x9da   : > { %1897 = vmax.xlane.f32.xlu0 %v1896_v55  ;;  %v3740_v55 = vld [vmem:[%s4585_s25 + $0x80] ss:$16 sps:$4 sm:$0xff]  }
 0xa5f   : > { %v1895_v56 = vpop.xlane.xlu1 %1894 }
 0xa60   : > { %v1899_v58 = vsub.f32 %v1891_v46, %v1895_v56  ;;  %v3728_v46 = vld [vmem:[%s4585_s25 + $0xc0] ss:$16 sps:$4 sm:$0xff]   ;;  %v3742_v56 = vld [vmem:[%s4585_s25 + $0x84] ss:$16 sps:$4 sm:$0xff]  }
 0xa62   : > { %v1901_v59 = vmul.f32 1.442695, %v1899_v58  ;;  %v3743_v58 = vld [vmem:[%s4585_s25 + $0x88] ss:$16 sps:$4 sm:$0xff]  }
 0xa63   : > { %v1898_v61 = vpop.xlane.xlu0 %1897 }
 0xa64   : > { %3826 = vpow2.f32 %v1901_v59  ;;  %v1900_v62 = vsub.f32 %v1892_v54, %v1898_v61  ;;  %v3737_v54 = vld [vmem:[%s4585_s25 + $0xa8] ss:$16 sps:$4 sm:$0xff]   ;;  %v3745_v59 = vld [vmem:[%s4585_s25 + $0x8c] ss:$16 sps:$4 sm:$0xff]   ;;  %v3748_v61 = vld [vmem:[%s4585_s25 + $0x64] ss:$16 sps:$4 sm:$0xff]  }
 0xa66   : > { %v1903_v63 = vmul.f32 1.442695, %v1900_v62  ;;  %v3751_v62 = vld [vmem:[%s4585_s25 + $0x6c] ss:$16 sps:$4 sm:$0xff]  }
 0xa68   : > { %3828 = vpow2.f32 %v1903_v63  ;;  %v3746_v63 = vld [vmem:[%s4585_s25 + $0x60] ss:$16 sps:$4 sm:$0xff]  }
 0xa71   : > { %v3827_v0 = vpop.eup %3826 }
 0xa72   : > { %v1905_v2 = vsel %vm1322_vm2, %v3827_v0, 0.0 }
 0xa73   : > { %1906 = vadd.xlane.f32.xlu0 %v1905_v2  ;;  %v3754_v2 = vld [vmem:[%s4585_s25 + $0x44] ss:$16 sps:$4 sm:$0xff]  }
 0xa75   : > { %v3829_v3 = vpop.eup %3828 }
 0xa76   : > { %v1908_v4 = vsel %vm1322_vm2, %v3829_v3, 0.0 }
 0xa77   : > { %1909 = vadd.xlane.f32.xlu1 %v1908_v4  ;;  %v3752_v4 = vld [vmem:[%s4585_s25 + $0x40] ss:$16 sps:$4 sm:$0xff]  }
 0xa89   : > { %1916 = vrot.lane.b32.xlu0 %v4698_v40, %s4207_s14 }
 0xa8f   : > { %v1829_v11 = vpop.f32.mrf.mxu0 }
 0xa90   : > { %v1836_v5 = vadd.f32 %v1829_v11, %v4770_v16  ;;  %v3720_v16 = vld [vmem:[%s4521_s7 + $0x38] sm:$0xff]  }
 0xa91   : > { %v3506_v6 = vpop.f32.mrf.mxu0  ;;  %3521 = vmatpush3.bf16.msra.mxu1 %v3720_v16  ;;  %v3755_v11 = vld [vmem:[%s4585_s25 + $0x48] ss:$16 sps:$4 sm:$0xff]  }
 0xa92   : > { %3522 = vmatprep.subr.bf16.mxu1 %v4203_v47  ;;  %v3763_v6 = vld [vmem:[%s4585_s25 + $0x2c] ss:$16 sps:$4 sm:$0xff]  }
 0xa93   : > { %v1832_v7 = vpop.f32.mrf.mxu0 }
 0xa94   : > { %v1837_v8 = vadd.f32 %v1832_v7, %v4773_v20  ;;  %v3758_v7 = vld [vmem:[%s4585_s25 + $0x20] ss:$16 sps:$4 sm:$0xff]  }
 0xa95   : > { %v3507_v9 = vpop.f32.mrf.mxu0  ;;  %3523 = vmatpush3.bf16.msra.mxu1 %v3721_v18 }
 0xa96   : > { %2327 = vmatprep.subr.bf16.mxu1 %v3727_v35  ;;  %v3766_v9 = vld [vmem:[%s4585_s25 + $0x4] ss:$16 sps:$4 sm:$0xff]  }
 0xa97   : > { %v3776_v35 = vld [vmem:[%s4529_s13 + $0x30] sm:$0xff]  }
 0xafc   : > { %v1907_v10 = vpop.xlane.xlu0 %1906 }
 0xafd   : > { %3830 = vrcp.f32 %v1907_v10  ;;  %v3769_v10 = vld [vmem:[%s4585_s25 + $0xc] ss:$16 sps:$4 sm:$0xff]  }
 0xb00   : > { %v1910_v12 = vpop.xlane.xlu1 %1909  ;;  %v1917_v1 = vpop.permute.xlu0 %1916 }
 0xb01   : > { %3832 = vrcp.f32 %v1910_v12  ;;  %3515 = vmatpush3.bf16.msra.mxu0 %v1917_v1  ;;  %v3764_v12 = vld [vmem:[%s4585_s25] ss:$16 sps:$4 sm:$0xff]   ;;  %v3767_v1 = vld [vmem:[%s4585_s25 + $0x8] ss:$16 sps:$4 sm:$0xff]  }
 0xb02   : > { %2284 = vmatprep.subr.bf16.mxu0 %v3724_v33  ;;  %v3774_v33 = vld [vmem:[%s4529_s13 + $0x70] sm:$0xff]  }
 0xb0a   : > { %v3831_v13 = vpop.eup %3830 }
 0xb0b   : > { %v1913_v15 = vmul.f32 %v3831_v13, %v3827_v0  ;;  %v3749_v0 = vld [vmem:[%s4585_s25 + $0x68] ss:$16 sps:$4 sm:$0xff]  }
 0xb0e   : > { %v3833_v14 = vpop.eup %3832 }
 0xb0f   : > { %v1914_v40 = vmul.f32 %v3833_v14, %v3829_v3  ;;  %v3757_v3 = vld [vmem:[%s4585_s25 + $0x4c] ss:$16 sps:$4 sm:$0xff]  }
 0xb11   : > { %v1915_v17 = vpack.c.bf16 %v1914_v40, %v1913_v15 }
 0xb13   : > { %3517 = vmatmul.mubr.msk.bf16.vlgmr.msra.gmra.mxu0 %vm1322_vm2, %v1915_v17 }
 0xb14   : > { %2316 = vmatprep.mubr.bf16.mxu0 %v4202_v29  ;;  %2285 = vmatpush1.bf16.msra.mxu0 %v3722_v25  ;;  %v3773_v25 = vld [vmem:[%s4529_s13 + $0xb8] sm:$0xff]  }
 0xb15   : > { %2286 = vmatprep.subr.bf16.mxu0 %v3730_v42  ;;  %v3785_v42 = vld [vmem:[%s4529_s13 + $0xa0] sm:$0xff]  }
 0xb18   : > { %2287 = vmatpush1.bf16.msra.mxu0 %v3728_v46  ;;  %v3787_v46 = vld [vmem:[%s4529_s13 + $0xd8] sm:$0xff]  }
 0xb19   : > { %2288 = vmatprep.subr.bf16.mxu0 %v3736_v51  ;;  %v3789_v51 = vld [vmem:[%s4529_s13 + $0x98] sm:$0xff]  }
 0xb1c   : > { %2289 = vmatpush1.bf16.msra.mxu0 %v3734_v53  ;;  %v3791_v53 = vld [vmem:[%s4529_s13 + $0xd0] sm:$0xff]  }
 0xb1d   : > { %2290 = vmatprep.subr.bf16.mxu0 %v3742_v56  ;;  %v3794_v56 = vld [vmem:[%s4529_s13 + $0x48] sm:$0xff]  }
 0xb20   : > { %2291 = vmatpush1.bf16.msra.mxu0 %v3740_v55  ;;  %v3793_v55 = vld [vmem:[%s4529_s13 + $0x90] sm:$0xff]  }
 0xb21   : > { %2292 = vmatprep.subr.bf16.mxu0 %v3748_v61  ;;  %v3797_v61 = vld [vmem:[%s4529_s13 + $0x88] sm:$0xff]  }
 0xb24   : > { %2293 = vmatpush1.bf16.msra.mxu0 %v3746_v63  ;;  %v3799_v63 = vld [vmem:[%s4529_s13 + $0xc0] sm:$0xff]  }
 0xb25   : > { %2294 = vmatprep.subr.bf16.mxu0 %v3754_v2  ;;  %v3801_v2 = vld [vmem:[%s4529_s13 + $0x80] sm:$0xff]  }
 0xb28   : > { %2295 = vmatpush1.bf16.msra.mxu0 %v3752_v4  ;;  %v2118_v4 = vsub.s32 3, %v4637_v49 }
 0xbd3   : > { %v1956_v19 = vpop.f32.mrf.mxu0 }
 0xbd5   : > { %v3518_v20 = vpop.f32.mrf.mxu0 }
 0xbd6   : > { %v3261_v20 = vld [vmem:[%s930_s28] ss:$0 sm:$0xff] }
 0xbd7   : > { %v1959_v21 = vpop.f32.mrf.mxu0 }
 0xbd8   : > { %v1963_v22 = vpack.c.bf16 %v1959_v21, %v1956_v19 }
 0xbd9   : > { %v3519_v24 = vpop.f32.mrf.mxu0 }
 0xbda   : > { %3525 = vmatmul.mubr.msk.bf16.vlgmr.msra.gmra.mxu1 %vm1264_vm1, %v1963_v22 }
 0xbdb   : > { %2359 = vmatprep.mubr.bf16.mxu1 %v4202_v29  ;;  %2328 = vmatpush1.bf16.msra.mxu1 %v3725_v34  ;;  %v3775_v34 = vld [vmem:[%s4529_s13 + $0xf0] sm:$0xff]  }
 0xbdc   : > { %2329 = vmatprep.subr.bf16.mxu1 %v3733_v43  ;;  %v3786_v43 = vld [vmem:[%s4529_s13 + $0x58] sm:$0xff]  }
 0xbdf   : > { %2330 = vmatpush1.bf16.msra.mxu1 %v3731_v48  ;;  %v3788_v48 = vld [vmem:[%s4529_s13 + $0x18] sm:$0xff]  }
 0xbe0   : > { %2331 = vmatprep.subr.bf16.mxu1 %v3739_v52  ;;  %v3790_v52 = vld [vmem:[%s4529_s13 + $0x50] sm:$0xff]  }
 0xbe3   : > { %2332 = vmatpush1.bf16.msra.mxu1 %v3737_v54  ;;  %v3792_v54 = vld [vmem:[%s4529_s13 + $0x10] sm:$0xff]  }
 0xbe4   : > { %2333 = vmatprep.subr.bf16.mxu1 %v3745_v59  ;;  %v3796_v59 = vld [vmem:[%s4529_s13 + $0x8] sm:$0xff]  }
 0xbe7   : > { %2334 = vmatpush1.bf16.msra.mxu1 %v3743_v58  ;;  %v3795_v58 = vld [vmem:[%s4529_s13 + $0xc8] sm:$0xff]  }
 0xbe8   : > { %2335 = vmatprep.subr.bf16.mxu1 %v3751_v62  ;;  %v3798_v62 = vld [vmem:[%s4529_s13 + $0x40] sm:$0xff]  }
 0xbeb   : > { %2336 = vmatpush1.bf16.msra.mxu1 %v3749_v0  ;;  %v3800_v0 = vld [vmem:[%s4529_s13] sm:$0xff]  }
 0xbec   : > { %2337 = vmatprep.subr.bf16.mxu1 %v3757_v3  ;;  %v2102_v3 = vld [vmem:[%s4595_s0] sm:$0xf]  ;;  %s5144_s0 = sld [smem:[#allocation29_spill]] }
 0xbef   : > { %2338 = vmatpush1.bf16.msra.mxu1 %v3755_v11  ;;  %v2107_v11 = vrot.slane %v2102_v3, %v1035_v57 }
 0xbf0   : > { %2339 = vmatprep.subr.bf16.mxu1 %v3763_v6 }
 0xbf2   : > { %p3330_p3 = scmp.lt.s32.totalorder %s5144_s0, 0 }
 0xc9a   : > { %v2017_v26 = vpop.f32.mrf.mxu1 }
 0xc9b   : > { %v2024_v27 = vadd.f32 %v2017_v26, %v1836_v5  ;;  %v3760_v5 = vld [vmem:[%s4585_s25 + $0x24] ss:$16 sps:$4 sm:$0xff]   ;;  %v3262_v26 = vld [vmem:[%s5140_s17] ss:$0 sm:$0xff] }
 0xc9c   : > { %v3526_v60 = vpop.f32.mrf.mxu1  ;;  %2296 = vmatprep.subr.bf16.mxu0 %v3760_v5  ;;  %v2115_v5 = vrot.slane %v2102_v3, %v1043_v32 }
 0xc9d   : > { %v2026_v47 = vadd.f32 %v2024_v27, %v4625_v44  ;;  %2297 = vmatpush1.bf16.msra.mxu0 %v3758_v7 }
 0xc9e   : > { %v2020_v23 = vpop.f32.mrf.mxu1  ;;  %2298 = vmatprep.subr.bf16.mxu0 %v3766_v9  ;;  %v2119_v9 = vrot.slane %v2102_v3, %v2118_v4 }
 0xc9f   : > { %v2025_v28 = vadd.f32 %v2020_v23, %v1837_v8  ;;  %2030 = vadd.xlane.f32.xlu1 %v2026_v47  ;;  %v3761_v8 = vld [vmem:[%s4585_s25 + $0x28] ss:$16 sps:$4 sm:$0xff]  }
 0xca0   : > { %v3527_v30 = vpop.f32.mrf.mxu1  ;;  %2340 = vmatpush1.bf16.msra.mxu1 %v3761_v8  ;;  %v2111_v8 = vrot.slane %v2102_v3, %v1039_v50 }
 0xca1   : > { %v2027_v31 = vadd.f32 %v2025_v28, %v4627_v45  ;;  %2341 = vmatprep.subr.bf16.mxu1 %v3769_v10  ;;  %2299 = vmatpush1.bf16.msra.mxu0 %v3764_v12  ;;  %v3770_v28 = vld [vmem:[%s4529_s13 + $0x78] sm:$0xff]  }
 0xca2   : > { %v3771_v30 = vld [vmem:[%s4529_s13 + $0xf8] sm:$0xff]   ;;  %3384 = vmatprep.subr.bf16.mxu0 %v3770_v28 }
 0xca3   : > { %2032 = vadd.xlane.f32.xlu1 %v2027_v31 }
 0xca4   : > { %2342 = vmatpush1.bf16.msra.mxu1 %v3767_v1 }
 0xca5   : > { %3406 = vmatprep.subr.bf16.mxu1 %v3771_v30 }
 0xd28   : > { %v2031_v29 = vpop.xlane.xlu1 %2030 }
 0xd29   : > { %v2035_v44 = vmul.f32 0.0078125, %v2031_v29  ;;  %v3777_v29 = vld [vmem:[%s4529_s13 + $0xb0] sm:$0xff]  }
 0xd2b   : > { %v4813_v36 = vsub.f32 %v2026_v47, %v2035_v44  ;;  %v3778_v44 = vld [vmem:[%s4529_s13 + $0x68] sm:$0xff]  }
 0xd2c   : > { %v2033_v37 = vpop.xlane.xlu1 %2032 }
 0xd2d   : > { %v2036_v45 = vmul.f32 0.0078125, %v2033_v37  ;;  %v2039_v38 = vmul.f32 %v4813_v36, %v4813_v36  ;;  %v3780_v37 = vld [vmem:[%s4529_s13 + $0x28] sm:$0xff]  }
 0xd2f   : > { %v4817_v39 = vsub.f32 %v2027_v31, %v2036_v45  ;;  %2041 = vadd.xlane.f32.xlu1 %v2039_v38  ;;  %v3772_v31 = vld [vmem:[%s4529_s13 + $0x38] sm:$0xff]   ;;  %v3781_v45 = vld [vmem:[%s4529_s13 + $0xa8] sm:$0xff]   ;;  %v3782_v38 = vld [vmem:[%s4529_s13 + $0x60] sm:$0xff]  }
 0xd31   : > { %v2040_v41 = vmul.f32 %v4817_v39, %v4817_v39 }
 0xd33   : > { %2043 = vadd.xlane.f32.xlu1 %v2040_v41  ;;  %v3784_v41 = vld [vmem:[%s4529_s13 + $0x20] sm:$0xff]  }
 0xdb8   : > { %v2042_v13 = vpop.xlane.xlu1 %2041 }
 0xdb9   : > { %v2045_v14 = vmul.f32 0.0078125, %v2042_v13 }
 0xdbb   : > { %v2047_v15 = vadd.f32 1e-12, %v2045_v14 }
 0xdbc   : > { %v2044_v40 = vpop.xlane.xlu1 %2043 }
 0xdbd   : > { %3834 = vrsqrt.f32 %v2047_v15  ;;  %v2046_v17 = vmul.f32 0.0078125, %v2044_v40 }
 0xdbf   : > { %v2048_v16 = vadd.f32 1e-12, %v2046_v17 }
 0xdc1   : > { %3836 = vrsqrt.f32 %v2048_v16 }
 0xdca   : > { %v3835_v18 = vpop.eup %3834 }
 0xdcb   : > { %v2051_v19 = vmul.f32 %v3835_v18, %v4813_v36  ;;  %v3779_v36 = vld [vmem:[%s4529_s13 + $0xe8] sm:$0xff]  }
 0xdcd   : > { %v2059_v24 = vmul.f32 %v3261_v20, %v2051_v19 }
 0xdce   : > { %v3837_v21 = vpop.eup %3836 }
 0xdcf   : > { %v2052_v22 = vmul.f32 %v3837_v21, %v4817_v39  ;;  %v4858_v60 = vadd.f32 %v3262_v26, %v2059_v24  ;;  %v3783_v39 = vld [vmem:[%s4529_s13 + $0xe0] sm:$0xff]  }
 0xdd1   : > { %v2060_v27 = vmul.f32 %v3261_v20, %v2052_v22 }
 0xdd3   : > { %v4860_v47 = vadd.f32 %v3262_v26, %v2060_v27 }
 0xdd5   : > { %v2069_v23 = vpack.c.bf16 %v4860_v47, %v4858_v60 }
 0xdd7   : > { %2317 = vmatmul.mubr.bf16.vlgmr.msra.gmra.mxu0 %v2069_v23  ;;  %2360 = vmatmul.mubr.bf16.vlgmr.msra.gmra.mxu1 %v2069_v23 }
 0xdd8   : > { %3385 = vmatpush3.bf16.msra.mxu0 %v3772_v31  ;;  %3407 = vmatpush3.bf16.msra.mxu1 %v3773_v25 }
 0xdd9   : > { %3386 = vmatprep.subr.bf16.mxu0 %v3774_v33  ;;  %3408 = vmatprep.subr.bf16.mxu1 %v3775_v34 }
 0xddc   : > { %3387 = vmatpush3.bf16.msra.mxu0 %v3776_v35  ;;  %3409 = vmatpush3.bf16.msra.mxu1 %v3777_v29 }
 0xddd   : > { %3388 = vmatprep.subr.bf16.mxu0 %v3778_v44  ;;  %3410 = vmatprep.subr.bf16.mxu1 %v3779_v36 }
 0xde0   : > { %3389 = vmatpush3.bf16.msra.mxu0 %v3780_v37  ;;  %3411 = vmatpush3.bf16.msra.mxu1 %v3781_v45 }
 0xde1   : > { %3390 = vmatprep.subr.bf16.mxu0 %v3782_v38  ;;  %3412 = vmatprep.subr.bf16.mxu1 %v3783_v39 }
 0xde4   : > { %3391 = vmatpush3.bf16.msra.mxu0 %v3784_v41  ;;  %3413 = vmatpush3.bf16.msra.mxu1 %v3785_v42 }
 0xde5   : > { %3392 = vmatprep.subr.bf16.mxu0 %v3786_v43  ;;  %3414 = vmatprep.subr.bf16.mxu1 %v3787_v46 }
 0xde8   : > { %3393 = vmatpush3.bf16.msra.mxu0 %v3788_v48  ;;  %3415 = vmatpush3.bf16.msra.mxu1 %v3789_v51 }
 0xde9   : > { %3394 = vmatprep.subr.bf16.mxu0 %v3790_v52  ;;  %3416 = vmatprep.subr.bf16.mxu1 %v3791_v53 }
 0xdec   : > { %3395 = vmatpush3.bf16.msra.mxu0 %v3792_v54  ;;  %3417 = vmatpush3.bf16.msra.mxu1 %v3793_v55 }
 0xded   : > { %3396 = vmatprep.subr.bf16.mxu0 %v3794_v56  ;;  %3418 = vmatprep.subr.bf16.mxu1 %v3795_v58 }
 0xdf0   : > { %3397 = vmatpush3.bf16.msra.mxu0 %v3796_v59  ;;  %3419 = vmatpush3.bf16.msra.mxu1 %v3797_v61 }
 0xdf1   : > { %3398 = vmatprep.subr.bf16.mxu0 %v3798_v62  ;;  %3420 = vmatprep.subr.bf16.mxu1 %v3799_v63 }
 0xdf4   : > { %3399 = vmatpush3.bf16.msra.mxu0 %v3800_v0  ;;  %3421 = vmatpush3.bf16.msra.mxu1 %v3801_v2 }
 0xe97   : > { %v2318_v6 = vpop.f32.mrf.mxu0  ;;  %v2361_v7 = vpop.f32.mrf.mxu1 }
 0xe98   : > { %v2319_v10 = vadd.f32 %v2318_v6, %v2107_v11  ;;  %v2362_v12 = vadd.f32 %v2361_v7, %v2115_v5 }
 0xe99   : > { %v2320_v1 = vpop.f32.mrf.mxu0  ;;  %v2363_v13 = vpop.f32.mrf.mxu1 }
 0xe9a   : > { %v2378_v14 = vmul.f32 0.70710677, %v2319_v10  ;;  %v2380_v15 = vmul.f32 0.70710677, %v2362_v12  ;;  %v2321_v40 = vadd.f32 %v2320_v1, %v2111_v8  ;;  %v2364_v17 = vadd.f32 %v2363_v13, %v2119_v9 }
 0xe9b   : > { %v2322_v16 = vpop.f32.mrf.mxu0  ;;  %v2365_v18 = vpop.f32.mrf.mxu1  ;;  %v2370_v35 = vmul.f32 0.5, %v2319_v10  ;;  %v2372_v56 = vmul.f32 0.5, %v2362_v12 }
 0xe9c   : > { %v2323_v57 = vadd.f32 %v2322_v16, %v2107_v11  ;;  %v2366_v19 = vadd.f32 %v2365_v18, %v2115_v5  ;;  %3838 = verf.f32 %v2378_v14  ;;  %v2379_v32 = vmul.f32 0.70710677, %v2321_v40 }
 0xe9d   : > { %v2324_v20 = vpop.f32.mrf.mxu0  ;;  %v2367_v21 = vpop.f32.mrf.mxu1  ;;  %3840 = verf.f32 %v2380_v15  ;;  %v2381_v49 = vmul.f32 0.70710677, %v2364_v17  ;;  %v2371_v29 = vmul.f32 0.5, %v2321_v40  ;;  %v2373_v52 = vmul.f32 0.5, %v2364_v17 }
 0xe9e   : > { %v2382_v50 = vmul.f32 0.70710677, %v2323_v57  ;;  %3842 = verf.f32 %v2379_v32  ;;  %v2384_v22 = vmul.f32 0.70710677, %v2366_v19  ;;  %v2325_v24 = vadd.f32 %v2324_v20, %v2111_v8  ;;  %v3295_v8 = vld [vmem:[%s942_s10] ss:$0 sm:$0xff] }
 0xe9f   : > { %v2368_v26 = vadd.f32 %v2367_v21, %v2119_v9  ;;  %3844 = verf.f32 %v2381_v49  ;;  %v2374_v39 = vmul.f32 0.5, %v2323_v57  ;;  %v2376_v46 = vmul.f32 0.5, %v2366_v19  ;;  %s5143_s10 = scalar_lea.vmem [#allocation13], %s4509_s8 }
 0xea0   : > { %3846 = verf.f32 %v2382_v50  ;;  %v2383_v27 = vmul.f32 0.70710677, %v2325_v24  ;;  %v2375_v48 = vmul.f32 0.5, %v2325_v24 }
 0xea1   : > { %3848 = verf.f32 %v2384_v22  ;;  %v2385_v23 = vmul.f32 0.70710677, %v2368_v26  ;;  %v2377_v54 = vmul.f32 0.5, %v2368_v26 }
 0xea2   : > { %3850 = verf.f32 %v2383_v27 }
 0xea3   : > { %3852 = verf.f32 %v2385_v23 }
 0xea9   : > { %v3839_v28 = vpop.eup %3838 }
 0xeaa   : > { %v3841_v30 = vpop.eup %3840  ;;  %v2394_v45 = vadd.f32 1.0, %v3839_v28 }
 0xeab   : > { %v3843_v31 = vpop.eup %3842  ;;  %v2396_v43 = vadd.f32 1.0, %v3841_v30 }
 0xeac   : > { %v3845_v25 = vpop.eup %3844  ;;  %v2395_v44 = vadd.f32 1.0, %v3843_v31  ;;  %v2402_v62 = vmul.f32 %v2394_v45, %v2370_v35  ;;  %v3328_v35 = vld [vmem:[%s5142_s24] ss:$0 sm:$0xff] }
 0xead   : > { %v3847_v33 = vpop.eup %3846  ;;  %v2397_v38 = vadd.f32 1.0, %v3845_v25  ;;  %v2404_v2 = vmul.f32 %v2396_v43, %v2372_v56 }
 0xeae   : > { %v3849_v34 = vpop.eup %3848  ;;  %v2398_v36 = vadd.f32 1.0, %v3847_v33  ;;  %v2403_v58 = vmul.f32 %v2395_v44, %v2371_v29  ;;  %v3329_v44 = vld [vmem:[%s5143_s10] ss:$0 sm:$0xff] }
 0xeaf   : > { %v3851_v37 = vpop.eup %3850  ;;  %v2400_v41 = vadd.f32 1.0, %v3849_v34  ;;  %v2405_v63 = vmul.f32 %v2397_v38, %v2373_v52 }
 0xeb0   : > { %v3853_v42 = vpop.eup %3852  ;;  %v2399_v51 = vadd.f32 1.0, %v3851_v37  ;;  %v2406_v53 = vmul.f32 %v2398_v36, %v2374_v39 }
 0xeb1   : > { %v2401_v55 = vadd.f32 1.0, %v3853_v42  ;;  %v2408_v59 = vmul.f32 %v2400_v41, %v2376_v46 }
 0xeb2   : > { %v2407_v61 = vmul.f32 %v2399_v51, %v2375_v48  ;;  %v2410_v4 = vpack.c.bf16 %v2406_v53, %v2402_v62 }
 0xeb3   : > { %v2409_v0 = vmul.f32 %v2401_v55, %v2377_v54  ;;  %v2412_v5 = vpack.c.bf16 %v2408_v59, %v2404_v2 }
 0xeb4   : > { %v2411_v3 = vpack.c.bf16 %v2407_v61, %v2403_v58 }
 0xeb5   : > { %v2413_v11 = vpack.c.bf16 %v2409_v0, %v2405_v63 }
 0xeb6   : > { %2709 = vmatprep.mubr.bf16.mxu0 %v2411_v3 }
 0xeb7   : > { %2750 = vmatprep.mubr.bf16.mxu1 %v2413_v11  ;;  %2710 = vmatmul.mubr.bf16.vlgmr.msra.gmra.mxu0 %v2410_v4 }
 0xeb8   : > { %2751 = vmatmul.mubr.bf16.vlgmr.msra.gmra.mxu1 %v2412_v5 }
 0xf77   : > { %v3400_v6 = vpop.f32.mrf.mxu0 }
 0xf78   : > { %v3422_v7 = vpop.f32.mrf.mxu1 }
 0xf79   : > { %v3401_v9 = vpop.f32.mrf.mxu0 }
 0xf7a   : > { %v3402_v10 = vadd.f32 %v3401_v9, %v3400_v6  ;;  %v3423_v12 = vpop.f32.mrf.mxu1 }
 0xf7b   : > { %v3403_v1 = vpop.f32.mrf.mxu0  ;;  %v3424_v14 = vadd.f32 %v3423_v12, %v3422_v7 }
 0xf7c   : > { %v2712_v13 = vadd.f32 %v3402_v10, %v3295_v8  ;;  %v3425_v15 = vpop.f32.mrf.mxu1 }
 0xf7d   : > { %v3404_v40 = vpop.f32.mrf.mxu0 }
 0xf7e   : > { %v2753_v17 = vadd.f32 %v3424_v14, %v2712_v13  ;;  %v3405_v16 = vadd.f32 %v3404_v40, %v3403_v1  ;;  %v3426_v18 = vpop.f32.mrf.mxu1 }
 0xf7f   : > { %v3427_v19 = vadd.f32 %v3426_v18, %v3425_v15 }
 0xf80   : > { %v2715_v57 = vadd.f32 %v3405_v16, %v3295_v8  ;;  %v2759_v32 = vadd.f32 %v2753_v17, %v4858_v60 }
 0xf82   : > { %v2756_v20 = vadd.f32 %v3427_v19, %v2715_v57  ;;  %2763 = vadd.xlane.f32.xlu1 %v2759_v32 }
 0xf84   : > { %v2760_v21 = vadd.f32 %v2756_v20, %v4860_v47 }
 0xf86   : > { %2765 = vadd.xlane.f32.xlu1 %v2760_v21 }
0x100b   : > { %v2764_v49 = vpop.xlane.xlu1 %2763 }
0x100c   : > { %v2767_v50 = vmul.f32 0.0078125, %v2764_v49 }
0x100e   : > { %v2769_v22 = vsub.f32 %v2759_v32, %v2767_v50 }
0x100f   : > { %v2766_v24 = vpop.xlane.xlu1 %2765 }
0x1010   : > { %v2768_v26 = vmul.f32 0.0078125, %v2766_v24  ;;  %v2771_v27 = vmul.f32 %v2769_v22, %v2769_v22 }
0x1012   : > { %v2770_v23 = vsub.f32 %v2760_v21, %v2768_v26  ;;  %2773 = vadd.xlane.f32.xlu0 %v2771_v27 }
0x1014   : > { %v2772_v28 = vmul.f32 %v2770_v23, %v2770_v23 }
0x1016   : > { %2775 = vadd.xlane.f32.xlu1 %v2772_v28 }
0x109b   : > { %v2774_v30 = vpop.xlane.xlu0 %2773 }
0x109c   : > { %v2777_v31 = vmul.f32 0.0078125, %v2774_v30 }
0x109e   : > { %v2779_v60 = vadd.f32 1e-12, %v2777_v31 }
0x109f   : > { %v2776_v25 = vpop.xlane.xlu1 %2775 }
0x10a0   : > { %3854 = vrsqrt.f32 %v2779_v60  ;;  %v2778_v33 = vmul.f32 0.0078125, %v2776_v25 }
0x10a2   : > { %v2780_v47 = vadd.f32 1e-12, %v2778_v33 }
0x10a4   : > { %3856 = vrsqrt.f32 %v2780_v47 }
0x10ad   : > { %v3855_v34 = vpop.eup %3854 }
0x10ae   : > { %v2783_v29 = vmul.f32 %v3855_v34, %v2769_v22 }
0x10b0   : > { %v2791_v36 = vmul.f32 %v3328_v35, %v2783_v29 }
0x10b1   : > { %v3857_v37 = vpop.eup %3856 }
0x10b2   : > { %v2799_v45 = vadd.f32 %v3329_v44, %v2791_v36  ;;  %v2784_v38 = vmul.f32 %v3857_v37, %v2770_v23 }
0x10b4   : > { %2801 = vst [vmem:[#allocation2] sm:$0xff] %v2799_v45  ;;  %v2792_v39 = vmul.f32 %v3328_v35, %v2784_v38  ;;  %2806 = sbr.rel (%p3330_p3) target bundleno = 4285 (0x10bd), region = 120 }
0x10b6   : > { %v2800_v41 = vadd.f32 %v3329_v44, %v2792_v39 }
0x10b8   : > { %2802 = vst [vmem:[#allocation2 + $0x8] sm:$0xff] %v2800_v41 }
0x10b9   : > { %v2807_v42 = vld [vmem:[#allocation3 + $0x8] sm:$0xff]  ;;  %v2808_v43 = vld [vmem:[#allocation3] sm:$0xff] }
0x10ba   : > { %v2809_v46 = vadd.f32 %v2807_v42, %v2799_v45  ;;  %v2810_v48 = vadd.f32 %v2808_v43, %v2800_v41 }
0x10bc   : > { %2811 = vst [vmem:[#allocation3 + $0x8] sm:$0xff] %v2809_v46  ;;  %2812 = vst [vmem:[#allocation3] sm:$0xff] %v2810_v48 }
0x10bd PF: > { %s5145_s8 = sld [smem:[#allocation29_spill]] }
0x10c3   : > { %p3331_p5 = scmp.ne.s32.totalorder %s5145_s8, 1 }
0x10c5   : > { %2816 = sbr.rel (%p3331_p5) target bundleno = 4431 (0x114f), region = 124 }
0x10ca   : > { %v2823_v51 = vld [vmem:[%s4565_s11] sm:$0xff]  ;;  %2817 = vst [vmem:[%s4597_s21] sm:$0xff] %v2799_v45  ;;  %2818 = vst [vmem:[%s4597_s21 + $0x8] sm:$0xff] %v2800_v41  ;;  %v4208_v52 = vmov 0   ;;  %v2824_v53 = vld [vmem:[%s4565_s11 + $0x8] sm:$0xff] }
0x10cb   : > { %3858 = vset.pattern.permute.xlu0 %v4208_v52  ;;  %v2819_v54 = vld [vmem:[#allocation3 + $0x8] sm:$0xff]  ;;  %v2820_v56 = vld [vmem:[#allocation3] sm:$0xff] }
0x10cc   : > { %2827 = vperm.xlu0 %3858, %v2823_v51   ;;  %v2821_v55 = vmul.f32 0.25, %v2819_v54  ;;  %v2822_v61 = vmul.f32 0.25, %v2820_v56 }
0x10d0   : > { %2832 = vperm.xlu0 %3858, %v2824_v53  }
0x1147   : > { %v2828_v58 = vpop.permute.xlu0 %2827 }
0x1148   : > { %v2835_v59 = vmul.f32 %v2828_v58, %v2821_v55 }
0x114a   : > { %2837 = vst [vmem:[%s4599_s1] sm:$0xff] %v2835_v59 }
0x114b   : > { %v2833_v62 = vpop.permute.xlu0 %2832 }
0x114c   : > { %v2836_v63 = vmul.f32 %v2833_v62, %v2822_v61 }
0x114e   : > { %2838 = vst [vmem:[%s4599_s1 + $0x8] sm:$0xff] %v2836_v63 }
0x114f PF: > { %s5146_s15 = sld [smem:[#allocation30_spill]]  ;;  %s2858_s3 = sshll.u32 %s4597_s21, 4  ;;  %s4932_s3 = int_to_ptr.vmem [resolvable:$true] %s2858_s3 }
0x1150   : > { %s5147_s23 = sld [smem:[#allocation40_spill]]  ;;  %s4027_s4 = scalar_lea.vmem %s4932_s3, 256 }
0x1151   : > { %s5149_s18 = sld [smem:[#allocation58_spill]]  ;;  %p4028_p11 = scmp.ne.s32.totalorder %s4932_s3, %s4027_s4 }
0x1152   : > { %s4209_s20 = smov [#allocation15]  }
0x1153   : > { %p4029_p13 = pnand %p4028_p11, %p4400_p12  ;;  %s4031_s12 = sshll.u32 %s4209_s20, 4  ;;  %s4032_s12 = int_to_ptr.vmem [resolvable:$false] %s4031_s12 }
0x1154   : > { %s4033_s14 = scalar_lea.vmem %s4032_s12, 512  ;;  %p4034_p1 = scmp.lt.s32.totalorder %s4932_s3, %s4032_s12 }
0x1155   : > { %s3345_s29 = sshll.u32 %s5146_s15, 8  ;;  %p4030_p0 = pneg %p4029_p13 }
0x1156   : > { %s2840_s6 = scalar_lea.sflag [#allocation6], %s5147_s23  ;;  %p4035_p7 = scmp.lt.s32.totalorder %s4033_s14, %s4027_s4 }
0x1157   : > { %s4929_s27 = scalar_lea.hbm %s5149_s18, %s3345_s29 }
0x1158   : > { %p4036_p9 = por %p4035_p7, %p4034_p1 }
0x115a   : > { %p4037_p10 = pnand %p4036_p9, %p4030_p0 }
0x115c   : > { %4040 = shalt.err (!%p4037_p10)
}
0x115d   : > { %s4041_s21 = scalar_lea.hbm %s4929_s27, 256  ;;  %s4045_s9 = scalar_lea.hbm %s5149_s18, 512 }
0x115e   : > { %p4042_p4 = scmp.ne.s32.totalorder %s4929_s27, %s4041_s21  ;;  %p4046_p3 = scmp.lt.s32.totalorder %s4929_s27, %s5149_s18 }
0x115f   : > { %p4047_p5 = scmp.lt.s32.totalorder %s4045_s9, %s4041_s21 }
0x1160   : > { %p4043_p6 = pnand %p4042_p4, %p4400_p12 }
0x1161   : > { %p4048_p11 = por %p4047_p5, %p4046_p3 }
0x1162   : > { %p4044_p8 = pneg %p4043_p6 }
0x1164   : > { %p4049_p13 = pnand %p4048_p11, %p4044_p8 }
0x1166   : > { %4052 = shalt.err (!%p4049_p13)
}
0x1167   : > { %s4210_s25 = smov 128   ;;  %s4211_s5 = smov 8  }
0x1168   : > { %3544 = dma.vmem_to_hbm [thread:$0]  (%p4400_p12), %s4932_s3, 256, %s4929_s27, %s2840_s6, %s4210_s25, %s4210_s25, %s4211_s5  }
0x1169   : > { %s5150_s13 = sld [smem:[#allocation59_spill]]  ;;  %s2874_s24 = sshll.u32 %s4599_s1, 4  ;;  %s4968_s24 = int_to_ptr.vmem [resolvable:$true] %s2874_s24 }
0x116a   : > { %s2845_s10 = scalar_lea.sflag [#allocation17], %s5147_s23  ;;  %s4053_s0 = scalar_lea.vmem %s4968_s24, 256 }
0x116b   : > { %p4054_p0 = scmp.ne.s32.totalorder %s4968_s24, %s4053_s0  ;;  %s4212_s8 = smov [#allocation16]  }
0x116c   : > { %s4057_s11 = sshll.u32 %s4212_s8, 4  ;;  %s4058_s11 = int_to_ptr.vmem [resolvable:$false] %s4057_s11 }
0x116d   : > { %p4055_p1 = pnand %p4054_p0, %p4400_p12  ;;  %s4059_s15 = scalar_lea.vmem %s4058_s11, 512 }
0x116e   : > { %p4060_p9 = scmp.lt.s32.totalorder %s4968_s24, %s4058_s11  ;;  %p4061_p10 = scmp.lt.s32.totalorder %s4059_s15, %s4053_s0 }
0x116f   : > { %s4965_s16 = scalar_lea.hbm %s5150_s13, %s3345_s29  ;;  %p4056_p7 = pneg %p4055_p1 }
0x1170   : > { %p4062_p4 = por %p4061_p10, %p4060_p9 }
0x1172   : > { %p4063_p6 = pnand %p4062_p4, %p4056_p7 }
0x1174   : > { %4066 = shalt.err (!%p4063_p6)
}
0x1175   : > { %s4067_s1 = scalar_lea.hbm %s4965_s16, 256  ;;  %s4071_s19 = scalar_lea.hbm %s5150_s13, 512 }
0x1176   : > { %p4068_p8 = scmp.ne.s32.totalorder %s4965_s16, %s4067_s1  ;;  %p4072_p11 = scmp.lt.s32.totalorder %s4965_s16, %s5150_s13 }
0x1177   : > { %p4073_p13 = scmp.lt.s32.totalorder %s4071_s19, %s4067_s1 }
0x1178   : > { %p4069_p3 = pnand %p4068_p8, %p4400_p12 }
0x1179   : > { %p4074_p0 = por %p4073_p13, %p4072_p11 }
0x117a   : > { %p4070_p5 = pneg %p4069_p3 }
0x117c   : > { %p4075_p1 = pnand %p4074_p0, %p4070_p5 }
0x117e   : > { %4078 = shalt.err (!%p4075_p1)
}
0x117f   : > { %3545 = dma.vmem_to_hbm [thread:$0]  (%p4400_p12), %s4968_s24, 256, %s4965_s16, %s2845_s10, %s4210_s25, %s4210_s25, %s4211_s5  }
0x1180 PF: > { %s5151_s6 = sld [smem:[#allocation33_spill]] }
0x1181   : > { %s5152_s4 = sld [smem:[#allocation24_spill]] }
0x1186   : > { %p3575_p7 = scmp.ge.s32.totalorder %s5151_s6, 2 }
0x1187   : > { %s2889_s12 = sand.u32 1, %s5152_s4  }
0x1188   : > { %p3568_p9 = pnand %p3575_p7, %p4410_p2  ;;  %s2890_s14 = scalar_lea.sflag [#allocation6], %s2889_s12 }
0x118a   : > { %p3569_p10 = pneg %p3568_p9 }
0x118c   : > { %4140 = dma.done.wait (%p3569_p10), %s2890_s14, 256  }
0x118d   : > { %4142 = vsyncadd (%p3569_p10), %s2890_s14, 4294967040  ;;  %s2899_s21 = scalar_lea.sflag [#allocation17], %s2889_s12 }
0x118e   : > { %4144 = dma.done.wait (%p3569_p10), %s2899_s21, 256  }
0x118f   : > { %4146 = vsyncadd (%p3569_p10), %s2899_s21, 4294967040  ;;  %s47_s2 = sadd.s32 1, %s5151_s6   ;;  %s5154_s27 = sld [smem:[#allocation25_spill]] }
0x1190   : > { %p44_p4 = scmp.ge.s32.totalorder %s47_s2, 6   ;;  %s5155_s28 = sld [smem:[#allocation26_spill]] }
0x1191   : > { %s5156_s29 = sld [smem:[#allocation37_spill]] }
0x1192   : > { %s5157_s30 = sld [smem:[#allocation27_spill]] }
0x1193   : > { %s5158_s0 = sld [smem:[#allocation28_spill]] }
0x1194   : > { %s5159_s19 = sld [smem:[#allocation36_spill]]  ;;  %46 = sbr.rel (!%p44_p4) target bundleno = 37 (0x25), region = 250 }
0x1195   : > { %s5160_s1 = sld [smem:[#allocation31_spill]] }
0x1196   : > { %s5161_s20 = sld [smem:[#allocation32_spill]] }
0x1197   : > { %s5162_s21 = sld [smem:[#allocation34_spill]] }
0x1198   : > { %s5163_s22 = sld [smem:[#allocation35_spill]] }
0x1199   :  { %2904 = vsyncpa [#allocation5], 1 }
0x119a   :  { %2906 = vsyncpa [#allocation5 + $0x1], 1 }
0x119b   :  { %2907 = vsyncpa [#allocation8], 1 }
0x119c   :  { %2909 = vsyncpa [#allocation8 + $0x1], 1 }
0x119d   :  { %2910 = vsyncpa [#allocation11], 1 }
0x119e   :  { %2912 = vsyncpa [#allocation11 + $0x1], 1 }
0x119f   :  { %2913 = vsyncpa [#allocation14], 1 }
0x11a0   :  { %2915 = vsyncpa [#allocation14 + $0x1], 1 }
0x11a1   :  { %2916 = vsyncpa [#allocation6], 1 }
0x11a2   :  { %2918 = vsyncpa [#allocation6 + $0x1], 1 }
0x11a3   :  { %2919 = vsyncpa [#allocation17], 1 }
0x11a4   :  { %2921 = vsyncpa [#allocation17 + $0x1], 1 }

</bundles_post_ra>
